<compile_context>
chip_gen: v7x
topology: tpu7x:2x2x1
jax: 0.10.0
libtpu: 0.0.40
codegen_flags: <defaults>
</compile_context>

<pallas_src>
import jax
import jax.numpy as jnp
from jax import lax
from jax.experimental import pallas as pl
from jax.experimental.pallas import tpu as pltpu

# Matmul operand dtype. f32 keeps the built-in correctness check tight; set to
# jnp.bfloat16 for MXU-native inputs on v5e/v6e/v7x (loosen the tolerance accordingly).
MM_DTYPE = jnp.float32


# ----------------------------- Pallas kernel --------------------------------


def resblock_kernel(x_ref, w1_ref, w2_ref, w3_ref, wsc_ref,
                    scale_ref, bias_ref, mask_ref, sel_ref,
                    o_ref, xbuf, abuf, pbuf):
    """Fused ResBlock forward for one image (grid axis = batch).

    x_ref:     (1, Cin, H, W)      input image (NCHW block)
    w1_ref:    (Cout, 9*Cin)       conv1 weights, taps packed along the contraction dim
    w2_ref:    (Cout, 9*Cout)      conv2 weights
    w3_ref:    (Cout, 9*Cout)      conv3 weights
    wsc_ref:   (Cout, Cin)         1x1 shortcut conv weights
    scale_ref: (4, Cout, 1)        folded eval-mode BN scales  (conv1, conv2, conv3, short)
    bias_ref:  (4, Cout, 1)        folded eval-mode BN biases (conv bias folded in)
    mask_ref:  (1, P)              1.0 inside the HxW interior of the padded grid, 0 on pad ring
    sel_ref:   (P, H/2*W/2)        one-hot selection matrix for the stride-2 pool subsample
    o_ref:     (1, Cout, H/2*W/2)  pooled output (NCHW flattened spatially)

    xbuf: (Cin,  Mext)  zero-padded, margin-extended flat input        (VMEM scratch)
    abuf: (Cout, Mext)  zero-padded, margin-extended flat activations  (VMEM scratch)
    pbuf: (9*max(Cin,Cout), P)  packed shifted windows for the conv matmul (VMEM scratch)

    Layout: flat index of padded-grid position (hp, wp) is  m0 + hp*Wp + wp  with
    m0 = Wp+1 margin on both ends, so every 3x3 tap is a static lane-offset slice.
    """
    _, Cin, H, W = x_ref.shape
    Cout = w1_ref.shape[0]
    Hp, Wp = H + 2, W + 2
    P = Hp * Wp
    m0 = Wp + 1                                       # margin width
    taps = [(ki - 1) * Wp + (kj - 1) for ki in range(3) for kj in range(3)]

    # ---- in-kernel zero padding: scatter the image rows into pre-zeroed scratch ----
    xbuf[...] = jnp.zeros_like(xbuf)
    abuf[...] = jnp.zeros_like(abuf)
    for h in range(H):
        start = m0 + (h + 1) * Wp + 1
        xbuf[:, start:start + W] = x_ref[0, :, h, :]

    valid = mask_ref[...]                             # (1, P)

    def conv3x3_bn(buf, w_ref, li):
        """3x3 conv (padding=1) + folded eval-mode BN, evaluated on the padded grid.

        The 9 shifted windows are packed along the contraction dim so the whole conv
        is a single MXU matmul with K = 9*C (instead of 9 shallow matmuls)."""
        c = buf.shape[0]
        for k, d in enumerate(taps):
            pbuf[k * c:(k + 1) * c, :] = buf[:, m0 + d:m0 + d + P]
        y = jnp.dot(w_ref[...].astype(MM_DTYPE),
                    pbuf[0:9 * c, :].astype(MM_DTYPE),
                    preferred_element_type=jnp.float32)      # (Cout, P)
        return y * scale_ref[li] + bias_ref[li]

    def swish(v):                                      # sigmoid(v) * v
        return v * (1.0 / (1.0 + jnp.exp(-v)))

    # conv1 -> BN -> sig*x ; re-zero the pad ring so it acts as conv2's zero padding
    a = swish(conv3x3_bn(xbuf, w1_ref, 0)) * valid
    abuf[:, m0:m0 + P] = a

    # conv2 -> BN -> sig*x
    a = swish(conv3x3_bn(abuf, w2_ref, 1)) * valid
    abuf[:, m0:m0 + P] = a

    # conv3 -> BN, plus 1x1 shortcut conv -> BN on the original input, then sig*x
    y = conv3x3_bn(abuf, w3_ref, 2)
    sc = jnp.dot(wsc_ref[...].astype(MM_DTYPE),
                 xbuf[:, m0:m0 + P].astype(MM_DTYPE),
                 preferred_element_type=jnp.float32)
    sc = sc * scale_ref[3] + bias_ref[3]
    out = swish(y + sc)
    # (no mask needed here: the pooling below only ever reads interior positions)
    abuf[:, m0:m0 + P] = out

    # ---- MaxPool2d(2, stride=2): max of the four shifted views of the padded grid,
    #      then pick the stride-2 window anchors with a one-hot selection matmul ----
    m = out
    for d in (1, Wp, Wp + 1):
        m = jnp.maximum(m, abuf[:, m0 + d:m0 + d + P])
    pooled = jnp.dot(m, sel_ref[...], preferred_element_type=jnp.float32)
    o_ref[0] = pooled.astype(o_ref.dtype)


# ------------------------------ JAX wrapper ----------------------------------


def fold_base_block(w_pt, conv_b, gamma, beta, mean, var, eps=1e-5):
    """Fold Conv2d bias + eval-mode BatchNorm into per-channel scale/bias, and repack
    the PyTorch (Cout, Cin, KH, KW) weight into (Cout, KH*KW*Cin) tap-packed form."""
    scale = gamma / jnp.sqrt(var + eps)
    bias = beta + scale * (conv_b - mean)
    cout, cin, kh, kw = w_pt.shape
    w_cat = jnp.transpose(w_pt, (0, 2, 3, 1)).reshape(cout, kh * kw * cin)
    return w_cat, scale, bias


def resblock_pallas(x, raw_params, eps=1e-5):
    """ResBlock.forward on NCHW input x with PyTorch-layout parameters."""
    N, Cin, H, W = x.shape
    assert H % 2 == 0 and W % 2 == 0, "2x2/stride-2 pooling assumes even H and W"

    w1, s1, b1 = fold_base_block(*raw_params["conv1"], eps=eps)
    w2, s2, b2 = fold_base_block(*raw_params["conv2"], eps=eps)
    w3, s3, b3 = fold_base_block(*raw_params["conv3"], eps=eps)
    wsc, ssc, bsc = fold_base_block(*raw_params["short"], eps=eps)
    Cout = w1.shape[0]

    Hp, Wp = H + 2, W + 2
    P = Hp * Wp
    Mext = P + 2 * (Wp + 1)
    H2, W2 = H // 2, W // 2

    scales = jnp.stack([s1, s2, s3, ssc]).reshape(4, Cout, 1)
    biases = jnp.stack([b1, b2, b3, bsc]).reshape(4, Cout, 1)

    # validity mask over the flattened padded grid (1 inside HxW, 0 on the pad ring)
    hp = jnp.arange(P) // Wp
    wp = jnp.arange(P) % Wp
    mask = (((hp >= 1) & (hp <= H) & (wp >= 1) & (wp <= W))
            .astype(jnp.float32).reshape(1, P))

    # one-hot selection: column j = (ho, wo) picks padded flat index of pixel (2ho, 2wo)
    j = jnp.arange(H2 * W2)
    sel_idx = (2 * (j // W2) + 1) * Wp + (2 * (j % W2) + 1)
    sel = (jnp.arange(P)[:, None] == sel_idx[None, :]).astype(jnp.float32)

    out = pl.pallas_call(
        resblock_kernel,
        out_shape=jax.ShapeDtypeStruct((N, Cout, H2 * W2), jnp.float32),
        grid=(N,),
        in_specs=[
            pl.BlockSpec((1, Cin, H, W), lambda n: (n, 0, 0, 0)),
            pl.BlockSpec((Cout, 9 * Cin), lambda n: (0, 0)),
            pl.BlockSpec((Cout, 9 * Cout), lambda n: (0, 0)),
            pl.BlockSpec((Cout, 9 * Cout), lambda n: (0, 0)),
            pl.BlockSpec((Cout, Cin), lambda n: (0, 0)),
            pl.BlockSpec((4, Cout, 1), lambda n: (0, 0, 0)),
            pl.BlockSpec((4, Cout, 1), lambda n: (0, 0, 0)),
            pl.BlockSpec((1, P), lambda n: (0, 0)),
            pl.BlockSpec((P, H2 * W2), lambda n: (0, 0)),
        ],
        out_specs=pl.BlockSpec((1, Cout, H2 * W2), lambda n: (n, 0, 0)),
        scratch_shapes=[
            pltpu.VMEM((Cin, Mext), jnp.float32),
            pltpu.VMEM((Cout, Mext), jnp.float32),
            pltpu.VMEM((9 * max(Cin, Cout), P), jnp.float32),
        ],
        compiler_params=pltpu.CompilerParams(
            dimension_semantics=("parallel",)),
    )(x, w1, w2, w3, wsc, scales, biases, mask, sel)

    return out.reshape(N, Cout, H2, W2)


# ----------------------- deterministic parameter init ------------------------


def init_base_block(key, cin, cout, k):
    ks = jax.random.split(key, 6)
    w = 0.1 * jax.random.normal(ks[0], (cout, cin, k, k), jnp.float32)
    b = 0.1 * jax.random.normal(ks[1], (cout,), jnp.float32)
    gamma = 1.0 + 0.1 * jax.random.normal(ks[2], (cout,), jnp.float32)
    beta = 0.1 * jax.random.normal(ks[3], (cout,), jnp.float32)
    mean = 0.1 * jax.random.normal(ks[4], (cout,), jnp.float32)
    var = 1.0 + 0.1 * jax.random.uniform(ks[5], (cout,), jnp.float32)
    return (w, b, gamma, beta, mean, var)


# --------------------------- pure-JAX reference -------------------------------


def resblock_reference(x, raw, eps=1e-5):
    def conv_bn(inp, p, pad):
        w, b, gamma, beta, mean, var = p
        y = lax.conv_general_dilated(
            inp, w, window_strides=(1, 1), padding=((pad, pad), (pad, pad)),
            dimension_numbers=("NCHW", "OIHW", "NCHW"))
        y = y + b[None, :, None, None]
        s = (gamma / jnp.sqrt(var + eps))[None, :, None, None]
        return s * (y - mean[None, :, None, None]) + beta[None, :, None, None]

    h = conv_bn(x, raw["conv1"], 1)
    h = jax.nn.sigmoid(h) * h
    h = conv_bn(h, raw["conv2"], 1)
    h = jax.nn.sigmoid(h) * h
    h = conv_bn(h, raw["conv3"], 1)
    h = h + conv_bn(x, raw["short"], 0)
    h = jax.nn.sigmoid(h) * h
    return lax.reduce_window(h, -jnp.inf, lax.max,
                             (1, 1, 2, 2), (1, 1, 2, 2), "VALID")


# ---------------------------------- main --------------------------------------

if __name__ == "__main__":
    N, Cin, H, W = 2, 4, 16, 16
    Cout = 8

    key = jax.random.PRNGKey(0)
    kx, k1, k2, k3, k4 = jax.random.split(key, 5)
    x = jax.random.normal(kx, (N, Cin, H, W), jnp.float32)   # NCHW like PyTorch

    raw = {
        "conv1": init_base_block(k1, Cin, Cout, 3),
        "conv2": init_base_block(k2, Cout, Cout, 3),
        "conv3": init_base_block(k3, Cout, Cout, 3),
        "short": init_base_block(k4, Cin, Cout, 1),
    }

    out = jax.block_until_ready(resblock_pallas(x, raw))
    ref = jax.block_until_ready(resblock_reference(x, raw))

    assert out.shape == (N, Cout, H // 2, W // 2), out.shape
    if not jnp.allclose(out, ref, rtol=1e-4, atol=1e-4):
        raise AssertionError(
            f"mismatch: max abs err {jnp.max(jnp.abs(out - ref))}")

    print("KERNEL_OK")
</pallas_src>

<mosaic_0001>
module attributes {stable_mosaic.version = 11 : i64} {
  func.func @resblock_kernel(%arg0: i32, %arg1: memref<1x4x16x16xf32, #tpu.memory_space<vmem>>, %arg2: memref<8x36xf32, #tpu.memory_space<vmem>>, %arg3: memref<8x72xf32, #tpu.memory_space<vmem>>, %arg4: memref<8x72xf32, #tpu.memory_space<vmem>>, %arg5: memref<8x4xf32, #tpu.memory_space<vmem>>, %arg6: memref<4x8x1xf32, #tpu.memory_space<vmem>>, %arg7: memref<4x8x1xf32, #tpu.memory_space<vmem>>, %arg8: memref<1x324xf32, #tpu.memory_space<vmem>>, %arg9: memref<324x64xf32, #tpu.memory_space<vmem>>, %arg10: memref<1x8x64xf32, #tpu.memory_space<vmem>>, %arg11: memref<4x362xf32, #tpu.memory_space<vmem>>, %arg12: memref<8x362xf32, #tpu.memory_space<vmem>>, %arg13: memref<72x324xf32, #tpu.memory_space<vmem>>) attributes {dimension_semantics = [#tpu.dimension_semantics<parallel>], iteration_bounds = array<i64: 2>, scalar_prefetch = 0 : i64, scratch_operands = 3 : i64, tpu.core_type = #tpu.core_type<tc>, window_params = [{transform_indices = @transform_0, window_bounds = array<i64: 1, 4, 16, 16>}, {pipeline_mode = #tpu.pipeline_mode<synchronous>, transform_indices = @transform_1, window_bounds = array<i64: 8, 36>}, {pipeline_mode = #tpu.pipeline_mode<synchronous>, transform_indices = @transform_2, window_bounds = array<i64: 8, 72>}, {pipeline_mode = #tpu.pipeline_mode<synchronous>, transform_indices = @transform_3, window_bounds = array<i64: 8, 72>}, {pipeline_mode = #tpu.pipeline_mode<synchronous>, transform_indices = @transform_4, window_bounds = array<i64: 8, 4>}, {pipeline_mode = #tpu.pipeline_mode<synchronous>, transform_indices = @transform_5, window_bounds = array<i64: 4, 8, 1>}, {pipeline_mode = #tpu.pipeline_mode<synchronous>, transform_indices = @transform_6, window_bounds = array<i64: 4, 8, 1>}, {pipeline_mode = #tpu.pipeline_mode<synchronous>, transform_indices = @transform_7, window_bounds = array<i64: 1, 324>}, {pipeline_mode = #tpu.pipeline_mode<synchronous>, transform_indices = @transform_8, window_bounds = array<i64: 324, 64>}, {transform_indices = @transform_9, window_bounds = array<i64: 1, 8, 64>}]} {
    %cst = arith.constant 0.000000e+00 : f32
    %0 = vector.broadcast %cst : f32 to vector<4x362xf32>
    %c0 = arith.constant 0 : index
    %c0_0 = arith.constant 0 : index
    %1 = vector.load %arg11[%c0, %c0_0] : memref<4x362xf32, #tpu.memory_space<vmem>>, vector<4x362xf32>
    tpu.vector_store %arg11[%c0, %c0_0], %0 {strides = array<i32>} : memref<4x362xf32, #tpu.memory_space<vmem>>, vector<4x362xf32>,
    %cst_1 = arith.constant 0.000000e+00 : f32
    %2 = vector.broadcast %cst_1 : f32 to vector<8x362xf32>
    %c0_2 = arith.constant 0 : index
    %c0_3 = arith.constant 0 : index
    %3 = vector.load %arg12[%c0_2, %c0_3] : memref<8x362xf32, #tpu.memory_space<vmem>>, vector<8x362xf32>
    tpu.vector_store %arg12[%c0_2, %c0_3], %2 {strides = array<i32>} : memref<8x362xf32, #tpu.memory_space<vmem>>, vector<8x362xf32>,
    %c0_4 = arith.constant 0 : index
    %c0_5 = arith.constant 0 : index
    %c0_6 = arith.constant 0 : index
    %c0_7 = arith.constant 0 : index
    %4 = vector.load %arg1[%c0_4, %c0_5, %c0_6, %c0_7] : memref<1x4x16x16xf32, #tpu.memory_space<vmem>>, vector<1x4x1x16xf32>
    %5 = vector.shape_cast %4 : vector<1x4x1x16xf32> to vector<4x16xf32>
    %c0_8 = arith.constant 0 : index
    %c38 = arith.constant 38 : index
    %6 = vector.load %arg11[%c0_8, %c38] : memref<4x362xf32, #tpu.memory_space<vmem>>, vector<4x16xf32>
    tpu.vector_store %arg11[%c0_8, %c38], %5 {strides = array<i32>} : memref<4x362xf32, #tpu.memory_space<vmem>>, vector<4x16xf32>,
    %c0_9 = arith.constant 0 : index
    %c0_10 = arith.constant 0 : index
    %c1 = arith.constant 1 : index
    %c0_11 = arith.constant 0 : index
    %7 = vector.load %arg1[%c0_9, %c0_10, %c1, %c0_11] : memref<1x4x16x16xf32, #tpu.memory_space<vmem>>, vector<1x4x1x16xf32>
    %8 = vector.shape_cast %7 : vector<1x4x1x16xf32> to vector<4x16xf32>
    %c0_12 = arith.constant 0 : index
    %c56 = arith.constant 56 : index
    %9 = vector.load %arg11[%c0_12, %c56] : memref<4x362xf32, #tpu.memory_space<vmem>>, vector<4x16xf32>
    tpu.vector_store %arg11[%c0_12, %c56], %8 {strides = array<i32>} : memref<4x362xf32, #tpu.memory_space<vmem>>, vector<4x16xf32>,
    %c0_13 = arith.constant 0 : index
    %c0_14 = arith.constant 0 : index
    %c2 = arith.constant 2 : index
    %c0_15 = arith.constant 0 : index
    %10 = vector.load %arg1[%c0_13, %c0_14, %c2, %c0_15] : memref<1x4x16x16xf32, #tpu.memory_space<vmem>>, vector<1x4x1x16xf32>
    %11 = vector.shape_cast %10 : vector<1x4x1x16xf32> to vector<4x16xf32>
    %c0_16 = arith.constant 0 : index
    %c74 = arith.constant 74 : index
    %12 = vector.load %arg11[%c0_16, %c74] : memref<4x362xf32, #tpu.memory_space<vmem>>, vector<4x16xf32>
    tpu.vector_store %arg11[%c0_16, %c74], %11 {strides = array<i32>} : memref<4x362xf32, #tpu.memory_space<vmem>>, vector<4x16xf32>,
    %c0_17 = arith.constant 0 : index
    %c0_18 = arith.constant 0 : index
    %c3 = arith.constant 3 : index
    %c0_19 = arith.constant 0 : index
    %13 = vector.load %arg1[%c0_17, %c0_18, %c3, %c0_19] : memref<1x4x16x16xf32, #tpu.memory_space<vmem>>, vector<1x4x1x16xf32>
    %14 = vector.shape_cast %13 : vector<1x4x1x16xf32> to vector<4x16xf32>
    %c0_20 = arith.constant 0 : index
    %c92 = arith.constant 92 : index
    %15 = vector.load %arg11[%c0_20, %c92] : memref<4x362xf32, #tpu.memory_space<vmem>>, vector<4x16xf32>
    tpu.vector_store %arg11[%c0_20, %c92], %14 {strides = array<i32>} : memref<4x362xf32, #tpu.memory_space<vmem>>, vector<4x16xf32>,
    %c0_21 = arith.constant 0 : index
    %c0_22 = arith.constant 0 : index
    %c4 = arith.constant 4 : index
    %c0_23 = arith.constant 0 : index
    %16 = vector.load %arg1[%c0_21, %c0_22, %c4, %c0_23] : memref<1x4x16x16xf32, #tpu.memory_space<vmem>>, vector<1x4x1x16xf32>
    %17 = vector.shape_cast %16 : vector<1x4x1x16xf32> to vector<4x16xf32>
    %c0_24 = arith.constant 0 : index
    %c110 = arith.constant 110 : index
    %18 = vector.load %arg11[%c0_24, %c110] : memref<4x362xf32, #tpu.memory_space<vmem>>, vector<4x16xf32>
    tpu.vector_store %arg11[%c0_24, %c110], %17 {strides = array<i32>} : memref<4x362xf32, #tpu.memory_space<vmem>>, vector<4x16xf32>,
    %c0_25 = arith.constant 0 : index
    %c0_26 = arith.constant 0 : index
    %c5 = arith.constant 5 : index
    %c0_27 = arith.constant 0 : index
    %19 = vector.load %arg1[%c0_25, %c0_26, %c5, %c0_27] : memref<1x4x16x16xf32, #tpu.memory_space<vmem>>, vector<1x4x1x16xf32>
    %20 = vector.shape_cast %19 : vector<1x4x1x16xf32> to vector<4x16xf32>
    %c0_28 = arith.constant 0 : index
    %c128 = arith.constant 128 : index
    %21 = vector.load %arg11[%c0_28, %c128] : memref<4x362xf32, #tpu.memory_space<vmem>>, vector<4x16xf32>
    tpu.vector_store %arg11[%c0_28, %c128], %20 {strides = array<i32>} : memref<4x362xf32, #tpu.memory_space<vmem>>, vector<4x16xf32>,
    %c0_29 = arith.constant 0 : index
    %c0_30 = arith.constant 0 : index
    %c6 = arith.constant 6 : index
    %c0_31 = arith.constant 0 : index
    %22 = vector.load %arg1[%c0_29, %c0_30, %c6, %c0_31] : memref<1x4x16x16xf32, #tpu.memory_space<vmem>>, vector<1x4x1x16xf32>
    %23 = vector.shape_cast %22 : vector<1x4x1x16xf32> to vector<4x16xf32>
    %c0_32 = arith.constant 0 : index
    %c146 = arith.constant 146 : index
    %24 = vector.load %arg11[%c0_32, %c146] : memref<4x362xf32, #tpu.memory_space<vmem>>, vector<4x16xf32>
    tpu.vector_store %arg11[%c0_32, %c146], %23 {strides = array<i32>} : memref<4x362xf32, #tpu.memory_space<vmem>>, vector<4x16xf32>,
    %c0_33 = arith.constant 0 : index
    %c0_34 = arith.constant 0 : index
    %c7 = arith.constant 7 : index
    %c0_35 = arith.constant 0 : index
    %25 = vector.load %arg1[%c0_33, %c0_34, %c7, %c0_35] : memref<1x4x16x16xf32, #tpu.memory_space<vmem>>, vector<1x4x1x16xf32>
    %26 = vector.shape_cast %25 : vector<1x4x1x16xf32> to vector<4x16xf32>
    %c0_36 = arith.constant 0 : index
    %c164 = arith.constant 164 : index
    %27 = vector.load %arg11[%c0_36, %c164] : memref<4x362xf32, #tpu.memory_space<vmem>>, vector<4x16xf32>
    tpu.vector_store %arg11[%c0_36, %c164], %26 {strides = array<i32>} : memref<4x362xf32, #tpu.memory_space<vmem>>, vector<4x16xf32>,
    %c0_37 = arith.constant 0 : index
    %c0_38 = arith.constant 0 : index
    %c8 = arith.constant 8 : index
    %c0_39 = arith.constant 0 : index
    %28 = vector.load %arg1[%c0_37, %c0_38, %c8, %c0_39] : memref<1x4x16x16xf32, #tpu.memory_space<vmem>>, vector<1x4x1x16xf32>
    %29 = vector.shape_cast %28 : vector<1x4x1x16xf32> to vector<4x16xf32>
    %c0_40 = arith.constant 0 : index
    %c182 = arith.constant 182 : index
    %30 = vector.load %arg11[%c0_40, %c182] : memref<4x362xf32, #tpu.memory_space<vmem>>, vector<4x16xf32>
    tpu.vector_store %arg11[%c0_40, %c182], %29 {strides = array<i32>} : memref<4x362xf32, #tpu.memory_space<vmem>>, vector<4x16xf32>,
    %c0_41 = arith.constant 0 : index
    %c0_42 = arith.constant 0 : index
    %c9 = arith.constant 9 : index
    %c0_43 = arith.constant 0 : index
    %31 = vector.load %arg1[%c0_41, %c0_42, %c9, %c0_43] : memref<1x4x16x16xf32, #tpu.memory_space<vmem>>, vector<1x4x1x16xf32>
    %32 = vector.shape_cast %31 : vector<1x4x1x16xf32> to vector<4x16xf32>
    %c0_44 = arith.constant 0 : index
    %c200 = arith.constant 200 : index
    %33 = vector.load %arg11[%c0_44, %c200] : memref<4x362xf32, #tpu.memory_space<vmem>>, vector<4x16xf32>
    tpu.vector_store %arg11[%c0_44, %c200], %32 {strides = array<i32>} : memref<4x362xf32, #tpu.memory_space<vmem>>, vector<4x16xf32>,
    %c0_45 = arith.constant 0 : index
    %c0_46 = arith.constant 0 : index
    %c10 = arith.constant 10 : index
    %c0_47 = arith.constant 0 : index
    %34 = vector.load %arg1[%c0_45, %c0_46, %c10, %c0_47] : memref<1x4x16x16xf32, #tpu.memory_space<vmem>>, vector<1x4x1x16xf32>
    %35 = vector.shape_cast %34 : vector<1x4x1x16xf32> to vector<4x16xf32>
    %c0_48 = arith.constant 0 : index
    %c218 = arith.constant 218 : index
    %36 = vector.load %arg11[%c0_48, %c218] : memref<4x362xf32, #tpu.memory_space<vmem>>, vector<4x16xf32>
    tpu.vector_store %arg11[%c0_48, %c218], %35 {strides = array<i32>} : memref<4x362xf32, #tpu.memory_space<vmem>>, vector<4x16xf32>,
    %c0_49 = arith.constant 0 : index
    %c0_50 = arith.constant 0 : index
    %c11 = arith.constant 11 : index
    %c0_51 = arith.constant 0 : index
    %37 = vector.load %arg1[%c0_49, %c0_50, %c11, %c0_51] : memref<1x4x16x16xf32, #tpu.memory_space<vmem>>, vector<1x4x1x16xf32>
    %38 = vector.shape_cast %37 : vector<1x4x1x16xf32> to vector<4x16xf32>
    %c0_52 = arith.constant 0 : index
    %c236 = arith.constant 236 : index
    %39 = vector.load %arg11[%c0_52, %c236] : memref<4x362xf32, #tpu.memory_space<vmem>>, vector<4x16xf32>
    tpu.vector_store %arg11[%c0_52, %c236], %38 {strides = array<i32>} : memref<4x362xf32, #tpu.memory_space<vmem>>, vector<4x16xf32>,
    %c0_53 = arith.constant 0 : index
    %c0_54 = arith.constant 0 : index
    %c12 = arith.constant 12 : index
    %c0_55 = arith.constant 0 : index
    %40 = vector.load %arg1[%c0_53, %c0_54, %c12, %c0_55] : memref<1x4x16x16xf32, #tpu.memory_space<vmem>>, vector<1x4x1x16xf32>
    %41 = vector.shape_cast %40 : vector<1x4x1x16xf32> to vector<4x16xf32>
    %c0_56 = arith.constant 0 : index
    %c254 = arith.constant 254 : index
    %42 = vector.load %arg11[%c0_56, %c254] : memref<4x362xf32, #tpu.memory_space<vmem>>, vector<4x16xf32>
    tpu.vector_store %arg11[%c0_56, %c254], %41 {strides = array<i32>} : memref<4x362xf32, #tpu.memory_space<vmem>>, vector<4x16xf32>,
    %c0_57 = arith.constant 0 : index
    %c0_58 = arith.constant 0 : index
    %c13 = arith.constant 13 : index
    %c0_59 = arith.constant 0 : index
    %43 = vector.load %arg1[%c0_57, %c0_58, %c13, %c0_59] : memref<1x4x16x16xf32, #tpu.memory_space<vmem>>, vector<1x4x1x16xf32>
    %44 = vector.shape_cast %43 : vector<1x4x1x16xf32> to vector<4x16xf32>
    %c0_60 = arith.constant 0 : index
    %c272 = arith.constant 272 : index
    %45 = vector.load %arg11[%c0_60, %c272] : memref<4x362xf32, #tpu.memory_space<vmem>>, vector<4x16xf32>
    tpu.vector_store %arg11[%c0_60, %c272], %44 {strides = array<i32>} : memref<4x362xf32, #tpu.memory_space<vmem>>, vector<4x16xf32>,
    %c0_61 = arith.constant 0 : index
    %c0_62 = arith.constant 0 : index
    %c14 = arith.constant 14 : index
    %c0_63 = arith.constant 0 : index
    %46 = vector.load %arg1[%c0_61, %c0_62, %c14, %c0_63] : memref<1x4x16x16xf32, #tpu.memory_space<vmem>>, vector<1x4x1x16xf32>
    %47 = vector.shape_cast %46 : vector<1x4x1x16xf32> to vector<4x16xf32>
    %c0_64 = arith.constant 0 : index
    %c290 = arith.constant 290 : index
    %48 = vector.load %arg11[%c0_64, %c290] : memref<4x362xf32, #tpu.memory_space<vmem>>, vector<4x16xf32>
    tpu.vector_store %arg11[%c0_64, %c290], %47 {strides = array<i32>} : memref<4x362xf32, #tpu.memory_space<vmem>>, vector<4x16xf32>,
    %c0_65 = arith.constant 0 : index
    %c0_66 = arith.constant 0 : index
    %c15 = arith.constant 15 : index
    %c0_67 = arith.constant 0 : index
    %49 = vector.load %arg1[%c0_65, %c0_66, %c15, %c0_67] : memref<1x4x16x16xf32, #tpu.memory_space<vmem>>, vector<1x4x1x16xf32>
    %50 = vector.shape_cast %49 : vector<1x4x1x16xf32> to vector<4x16xf32>
    %c0_68 = arith.constant 0 : index
    %c308 = arith.constant 308 : index
    %51 = vector.load %arg11[%c0_68, %c308] : memref<4x362xf32, #tpu.memory_space<vmem>>, vector<4x16xf32>
    tpu.vector_store %arg11[%c0_68, %c308], %50 {strides = array<i32>} : memref<4x362xf32, #tpu.memory_space<vmem>>, vector<4x16xf32>,
    %c0_69 = arith.constant 0 : index
    %c0_70 = arith.constant 0 : index
    %52 = vector.load %arg8[%c0_69, %c0_70] : memref<1x324xf32, #tpu.memory_space<vmem>>, vector<1x324xf32>
    %c0_71 = arith.constant 0 : index
    %c0_72 = arith.constant 0 : index
    %53 = vector.load %arg11[%c0_71, %c0_72] : memref<4x362xf32, #tpu.memory_space<vmem>>, vector<4x324xf32>
    %c0_73 = arith.constant 0 : index
    %c0_74 = arith.constant 0 : index
    %54 = vector.load %arg13[%c0_73, %c0_74] : memref<72x324xf32, #tpu.memory_space<vmem>>, vector<4x324xf32>
    tpu.vector_store %arg13[%c0_73, %c0_74], %53 {strides = array<i32>} : memref<72x324xf32, #tpu.memory_space<vmem>>, vector<4x324xf32>,
    %c0_75 = arith.constant 0 : index
    %c1_76 = arith.constant 1 : index
    %55 = vector.load %arg11[%c0_75, %c1_76] : memref<4x362xf32, #tpu.memory_space<vmem>>, vector<4x324xf32>
    %c4_77 = arith.constant 4 : index
    %c0_78 = arith.constant 0 : index
    %56 = vector.load %arg13[%c4_77, %c0_78] : memref<72x324xf32, #tpu.memory_space<vmem>>, vector<4x324xf32>
    tpu.vector_store %arg13[%c4_77, %c0_78], %55 {strides = array<i32>} : memref<72x324xf32, #tpu.memory_space<vmem>>, vector<4x324xf32>,
    %c0_79 = arith.constant 0 : index
    %c2_80 = arith.constant 2 : index
    %57 = vector.load %arg11[%c0_79, %c2_80] : memref<4x362xf32, #tpu.memory_space<vmem>>, vector<4x324xf32>
    %c8_81 = arith.constant 8 : index
    %c0_82 = arith.constant 0 : index
    %58 = vector.load %arg13[%c8_81, %c0_82] : memref<72x324xf32, #tpu.memory_space<vmem>>, vector<4x324xf32>
    tpu.vector_store %arg13[%c8_81, %c0_82], %57 {strides = array<i32>} : memref<72x324xf32, #tpu.memory_space<vmem>>, vector<4x324xf32>,
    %c0_83 = arith.constant 0 : index
    %c18 = arith.constant 18 : index
    %59 = vector.load %arg11[%c0_83, %c18] : memref<4x362xf32, #tpu.memory_space<vmem>>, vector<4x324xf32>
    %c12_84 = arith.constant 12 : index
    %c0_85 = arith.constant 0 : index
    %60 = vector.load %arg13[%c12_84, %c0_85] : memref<72x324xf32, #tpu.memory_space<vmem>>, vector<4x324xf32>
    tpu.vector_store %arg13[%c12_84, %c0_85], %59 {strides = array<i32>} : memref<72x324xf32, #tpu.memory_space<vmem>>, vector<4x324xf32>,
    %c0_86 = arith.constant 0 : index
    %c19 = arith.constant 19 : index
    %61 = vector.load %arg11[%c0_86, %c19] : memref<4x362xf32, #tpu.memory_space<vmem>>, vector<4x324xf32>
    %c16 = arith.constant 16 : index
    %c0_87 = arith.constant 0 : index
    %62 = vector.load %arg13[%c16, %c0_87] : memref<72x324xf32, #tpu.memory_space<vmem>>, vector<4x324xf32>
    tpu.vector_store %arg13[%c16, %c0_87], %61 {strides = array<i32>} : memref<72x324xf32, #tpu.memory_space<vmem>>, vector<4x324xf32>,
    %c0_88 = arith.constant 0 : index
    %c20 = arith.constant 20 : index
    %63 = vector.load %arg11[%c0_88, %c20] : memref<4x362xf32, #tpu.memory_space<vmem>>, vector<4x324xf32>
    %c20_89 = arith.constant 20 : index
    %c0_90 = arith.constant 0 : index
    %64 = vector.load %arg13[%c20_89, %c0_90] : memref<72x324xf32, #tpu.memory_space<vmem>>, vector<4x324xf32>
    tpu.vector_store %arg13[%c20_89, %c0_90], %63 {strides = array<i32>} : memref<72x324xf32, #tpu.memory_space<vmem>>, vector<4x324xf32>,
    %c0_91 = arith.constant 0 : index
    %c36 = arith.constant 36 : index
    %65 = vector.load %arg11[%c0_91, %c36] : memref<4x362xf32, #tpu.memory_space<vmem>>, vector<4x324xf32>
    %c24 = arith.constant 24 : index
    %c0_92 = arith.constant 0 : index
    %66 = vector.load %arg13[%c24, %c0_92] : memref<72x324xf32, #tpu.memory_space<vmem>>, vector<4x324xf32>
    tpu.vector_store %arg13[%c24, %c0_92], %65 {strides = array<i32>} : memref<72x324xf32, #tpu.memory_space<vmem>>, vector<4x324xf32>,
    %c0_93 = arith.constant 0 : index
    %c37 = arith.constant 37 : index
    %67 = vector.load %arg11[%c0_93, %c37] : memref<4x362xf32, #tpu.memory_space<vmem>>, vector<4x324xf32>
    %c28 = arith.constant 28 : index
    %c0_94 = arith.constant 0 : index
    %68 = vector.load %arg13[%c28, %c0_94] : memref<72x324xf32, #tpu.memory_space<vmem>>, vector<4x324xf32>
    tpu.vector_store %arg13[%c28, %c0_94], %67 {strides = array<i32>} : memref<72x324xf32, #tpu.memory_space<vmem>>, vector<4x324xf32>,
    %c0_95 = arith.constant 0 : index
    %c38_96 = arith.constant 38 : index
    %69 = vector.load %arg11[%c0_95, %c38_96] : memref<4x362xf32, #tpu.memory_space<vmem>>, vector<4x324xf32>
    %c32 = arith.constant 32 : index
    %c0_97 = arith.constant 0 : index
    %70 = vector.load %arg13[%c32, %c0_97] : memref<72x324xf32, #tpu.memory_space<vmem>>, vector<4x324xf32>
    tpu.vector_store %arg13[%c32, %c0_97], %69 {strides = array<i32>} : memref<72x324xf32, #tpu.memory_space<vmem>>, vector<4x324xf32>,
    %c0_98 = arith.constant 0 : index
    %c0_99 = arith.constant 0 : index
    %71 = vector.load %arg2[%c0_98, %c0_99] : memref<8x36xf32, #tpu.memory_space<vmem>>, vector<8x36xf32>
    %c0_100 = arith.constant 0 : index
    %c0_101 = arith.constant 0 : index
    %72 = vector.load %arg13[%c0_100, %c0_101] : memref<72x324xf32, #tpu.memory_space<vmem>>, vector<36x324xf32>
    %cst_102 = arith.constant dense<0.000000e+00> : vector<8x324xf32>
    %73 = tpu.matmul %71, %72, %cst_102 {dimension_numbers = #tpu.dot_dimension_numbers<[1], [0], [0], [1], [0, 0, 1, 1], [], []>} : vector<8x36xf32>, vector<36x324xf32>, vector<8x324xf32> -> vector<8x324xf32>
    %c0_103 = arith.constant 0 : index
    %c0_104 = arith.constant 0 : index
    %c0_105 = arith.constant 0 : index
    %74 = vector.load %arg6[%c0_103, %c0_104, %c0_105] : memref<4x8x1xf32, #tpu.memory_space<vmem>>, vector<1x8x1xf32>
    %75 = vector.shape_cast %74 : vector<1x8x1xf32> to vector<8x1xf32>
    %76 = vector.broadcast %75 : vector<8x1xf32> to vector<8x324xf32>
    %77 = arith.mulf %73, %76 : vector<8x324xf32>
    %c0_106 = arith.constant 0 : index
    %c0_107 = arith.constant 0 : index
    %c0_108 = arith.constant 0 : index
    %78 = vector.load %arg7[%c0_106, %c0_107, %c0_108] : memref<4x8x1xf32, #tpu.memory_space<vmem>>, vector<1x8x1xf32>
    %79 = vector.shape_cast %78 : vector<1x8x1xf32> to vector<8x1xf32>
    %80 = vector.broadcast %79 : vector<8x1xf32> to vector<8x324xf32>
    %81 = arith.addf %77, %80 : vector<8x324xf32>
    %cst_109 = arith.constant 0.000000e+00 : f32
    %82 = vector.broadcast %cst_109 : f32 to vector<8x324xf32>
    %83 = arith.subf %82, %81 : vector<8x324xf32>
    %84 = math.exp %83 : vector<8x324xf32>
    %cst_110 = arith.constant 1.000000e+00 : f32
    %85 = vector.broadcast %cst_110 : f32 to vector<8x324xf32>
    %86 = arith.addf %85, %84 : vector<8x324xf32>
    %cst_111 = arith.constant 1.000000e+00 : f32
    %87 = vector.broadcast %cst_111 : f32 to vector<8x324xf32>
    %88 = arith.divf %87, %86 : vector<8x324xf32>
    %89 = arith.mulf %81, %88 : vector<8x324xf32>
    %90 = vector.broadcast %52 : vector<1x324xf32> to vector<8x324xf32>
    %91 = arith.mulf %89, %90 : vector<8x324xf32>
    %c0_112 = arith.constant 0 : index
    %c19_113 = arith.constant 19 : index
    %92 = vector.load %arg12[%c0_112, %c19_113] : memref<8x362xf32, #tpu.memory_space<vmem>>, vector<8x324xf32>
    tpu.vector_store %arg12[%c0_112, %c19_113], %91 {strides = array<i32>} : memref<8x362xf32, #tpu.memory_space<vmem>>, vector<8x324xf32>,
    %c0_114 = arith.constant 0 : index
    %c0_115 = arith.constant 0 : index
    %93 = vector.load %arg12[%c0_114, %c0_115] : memref<8x362xf32, #tpu.memory_space<vmem>>, vector<8x324xf32>
    %c0_116 = arith.constant 0 : index
    %c0_117 = arith.constant 0 : index
    %94 = vector.load %arg13[%c0_116, %c0_117] : memref<72x324xf32, #tpu.memory_space<vmem>>, vector<8x324xf32>
    tpu.vector_store %arg13[%c0_116, %c0_117], %93 {strides = array<i32>} : memref<72x324xf32, #tpu.memory_space<vmem>>, vector<8x324xf32>,
    %c0_118 = arith.constant 0 : index
    %c1_119 = arith.constant 1 : index
    %95 = vector.load %arg12[%c0_118, %c1_119] : memref<8x362xf32, #tpu.memory_space<vmem>>, vector<8x324xf32>
    %c8_120 = arith.constant 8 : index
    %c0_121 = arith.constant 0 : index
    %96 = vector.load %arg13[%c8_120, %c0_121] : memref<72x324xf32, #tpu.memory_space<vmem>>, vector<8x324xf32>
    tpu.vector_store %arg13[%c8_120, %c0_121], %95 {strides = array<i32>} : memref<72x324xf32, #tpu.memory_space<vmem>>, vector<8x324xf32>,
    %c0_122 = arith.constant 0 : index
    %c2_123 = arith.constant 2 : index
    %97 = vector.load %arg12[%c0_122, %c2_123] : memref<8x362xf32, #tpu.memory_space<vmem>>, vector<8x324xf32>
    %c16_124 = arith.constant 16 : index
    %c0_125 = arith.constant 0 : index
    %98 = vector.load %arg13[%c16_124, %c0_125] : memref<72x324xf32, #tpu.memory_space<vmem>>, vector<8x324xf32>
    tpu.vector_store %arg13[%c16_124, %c0_125], %97 {strides = array<i32>} : memref<72x324xf32, #tpu.memory_space<vmem>>, vector<8x324xf32>,
    %c0_126 = arith.constant 0 : index
    %c18_127 = arith.constant 18 : index
    %99 = vector.load %arg12[%c0_126, %c18_127] : memref<8x362xf32, #tpu.memory_space<vmem>>, vector<8x324xf32>
    %c24_128 = arith.constant 24 : index
    %c0_129 = arith.constant 0 : index
    %100 = vector.load %arg13[%c24_128, %c0_129] : memref<72x324xf32, #tpu.memory_space<vmem>>, vector<8x324xf32>
    tpu.vector_store %arg13[%c24_128, %c0_129], %99 {strides = array<i32>} : memref<72x324xf32, #tpu.memory_space<vmem>>, vector<8x324xf32>,
    %c0_130 = arith.constant 0 : index
    %c19_131 = arith.constant 19 : index
    %101 = vector.load %arg12[%c0_130, %c19_131] : memref<8x362xf32, #tpu.memory_space<vmem>>, vector<8x324xf32>
    %c32_132 = arith.constant 32 : index
    %c0_133 = arith.constant 0 : index
    %102 = vector.load %arg13[%c32_132, %c0_133] : memref<72x324xf32, #tpu.memory_space<vmem>>, vector<8x324xf32>
    tpu.vector_store %arg13[%c32_132, %c0_133], %101 {strides = array<i32>} : memref<72x324xf32, #tpu.memory_space<vmem>>, vector<8x324xf32>,
    %c0_134 = arith.constant 0 : index
    %c20_135 = arith.constant 20 : index
    %103 = vector.load %arg12[%c0_134, %c20_135] : memref<8x362xf32, #tpu.memory_space<vmem>>, vector<8x324xf32>
    %c40 = arith.constant 40 : index
    %c0_136 = arith.constant 0 : index
    %104 = vector.load %arg13[%c40, %c0_136] : memref<72x324xf32, #tpu.memory_space<vmem>>, vector<8x324xf32>
    tpu.vector_store %arg13[%c40, %c0_136], %103 {strides = array<i32>} : memref<72x324xf32, #tpu.memory_space<vmem>>, vector<8x324xf32>,
    %c0_137 = arith.constant 0 : index
    %c36_138 = arith.constant 36 : index
    %105 = vector.load %arg12[%c0_137, %c36_138] : memref<8x362xf32, #tpu.memory_space<vmem>>, vector<8x324xf32>
    %c48 = arith.constant 48 : index
    %c0_139 = arith.constant 0 : index
    %106 = vector.load %arg13[%c48, %c0_139] : memref<72x324xf32, #tpu.memory_space<vmem>>, vector<8x324xf32>
    tpu.vector_store %arg13[%c48, %c0_139], %105 {strides = array<i32>} : memref<72x324xf32, #tpu.memory_space<vmem>>, vector<8x324xf32>,
    %c0_140 = arith.constant 0 : index
    %c37_141 = arith.constant 37 : index
    %107 = vector.load %arg12[%c0_140, %c37_141] : memref<8x362xf32, #tpu.memory_space<vmem>>, vector<8x324xf32>
    %c56_142 = arith.constant 56 : index
    %c0_143 = arith.constant 0 : index
    %108 = vector.load %arg13[%c56_142, %c0_143] : memref<72x324xf32, #tpu.memory_space<vmem>>, vector<8x324xf32>
    tpu.vector_store %arg13[%c56_142, %c0_143], %107 {strides = array<i32>} : memref<72x324xf32, #tpu.memory_space<vmem>>, vector<8x324xf32>,
    %c0_144 = arith.constant 0 : index
    %c38_145 = arith.constant 38 : index
    %109 = vector.load %arg12[%c0_144, %c38_145] : memref<8x362xf32, #tpu.memory_space<vmem>>, vector<8x324xf32>
    %c64 = arith.constant 64 : index
    %c0_146 = arith.constant 0 : index
    %110 = vector.load %arg13[%c64, %c0_146] : memref<72x324xf32, #tpu.memory_space<vmem>>, vector<8x324xf32>
    tpu.vector_store %arg13[%c64, %c0_146], %109 {strides = array<i32>} : memref<72x324xf32, #tpu.memory_space<vmem>>, vector<8x324xf32>,
    %c0_147 = arith.constant 0 : index
    %c0_148 = arith.constant 0 : index
    %111 = vector.load %arg3[%c0_147, %c0_148] : memref<8x72xf32, #tpu.memory_space<vmem>>, vector<8x72xf32>
    %c0_149 = arith.constant 0 : index
    %c0_150 = arith.constant 0 : index
    %112 = vector.load %arg13[%c0_149, %c0_150] : memref<72x324xf32, #tpu.memory_space<vmem>>, vector<72x324xf32>
    %cst_151 = arith.constant dense<0.000000e+00> : vector<8x324xf32>
    %113 = tpu.matmul %111, %112, %cst_151 {dimension_numbers = #tpu.dot_dimension_numbers<[1], [0], [0], [1], [0, 0, 1, 1], [], []>} : vector<8x72xf32>, vector<72x324xf32>, vector<8x324xf32> -> vector<8x324xf32>
    %c1_152 = arith.constant 1 : index
    %c0_153 = arith.constant 0 : index
    %c0_154 = arith.constant 0 : index
    %114 = vector.load %arg6[%c1_152, %c0_153, %c0_154] : memref<4x8x1xf32, #tpu.memory_space<vmem>>, vector<1x8x1xf32>
    %115 = vector.shape_cast %114 : vector<1x8x1xf32> to vector<8x1xf32>
    %116 = vector.broadcast %115 : vector<8x1xf32> to vector<8x324xf32>
    %117 = arith.mulf %113, %116 : vector<8x324xf32>
    %c1_155 = arith.constant 1 : index
    %c0_156 = arith.constant 0 : index
    %c0_157 = arith.constant 0 : index
    %118 = vector.load %arg7[%c1_155, %c0_156, %c0_157] : memref<4x8x1xf32, #tpu.memory_space<vmem>>, vector<1x8x1xf32>
    %119 = vector.shape_cast %118 : vector<1x8x1xf32> to vector<8x1xf32>
    %120 = vector.broadcast %119 : vector<8x1xf32> to vector<8x324xf32>
    %121 = arith.addf %117, %120 : vector<8x324xf32>
    %cst_158 = arith.constant 0.000000e+00 : f32
    %122 = vector.broadcast %cst_158 : f32 to vector<8x324xf32>
    %123 = arith.subf %122, %121 : vector<8x324xf32>
    %124 = math.exp %123 : vector<8x324xf32>
    %cst_159 = arith.constant 1.000000e+00 : f32
    %125 = vector.broadcast %cst_159 : f32 to vector<8x324xf32>
    %126 = arith.addf %125, %124 : vector<8x324xf32>
    %cst_160 = arith.constant 1.000000e+00 : f32
    %127 = vector.broadcast %cst_160 : f32 to vector<8x324xf32>
    %128 = arith.divf %127, %126 : vector<8x324xf32>
    %129 = arith.mulf %121, %128 : vector<8x324xf32>
    %130 = vector.broadcast %52 : vector<1x324xf32> to vector<8x324xf32>
    %131 = arith.mulf %129, %130 : vector<8x324xf32>
    %c0_161 = arith.constant 0 : index
    %c19_162 = arith.constant 19 : index
    %132 = vector.load %arg12[%c0_161, %c19_162] : memref<8x362xf32, #tpu.memory_space<vmem>>, vector<8x324xf32>
    tpu.vector_store %arg12[%c0_161, %c19_162], %131 {strides = array<i32>} : memref<8x362xf32, #tpu.memory_space<vmem>>, vector<8x324xf32>,
    %c0_163 = arith.constant 0 : index
    %c0_164 = arith.constant 0 : index
    %133 = vector.load %arg12[%c0_163, %c0_164] : memref<8x362xf32, #tpu.memory_space<vmem>>, vector<8x324xf32>
    %c0_165 = arith.constant 0 : index
    %c0_166 = arith.constant 0 : index
    %134 = vector.load %arg13[%c0_165, %c0_166] : memref<72x324xf32, #tpu.memory_space<vmem>>, vector<8x324xf32>
    tpu.vector_store %arg13[%c0_165, %c0_166], %133 {strides = array<i32>} : memref<72x324xf32, #tpu.memory_space<vmem>>, vector<8x324xf32>,
    %c0_167 = arith.constant 0 : index
    %c1_168 = arith.constant 1 : index
    %135 = vector.load %arg12[%c0_167, %c1_168] : memref<8x362xf32, #tpu.memory_space<vmem>>, vector<8x324xf32>
    %c8_169 = arith.constant 8 : index
    %c0_170 = arith.constant 0 : index
    %136 = vector.load %arg13[%c8_169, %c0_170] : memref<72x324xf32, #tpu.memory_space<vmem>>, vector<8x324xf32>
    tpu.vector_store %arg13[%c8_169, %c0_170], %135 {strides = array<i32>} : memref<72x324xf32, #tpu.memory_space<vmem>>, vector<8x324xf32>,
    %c0_171 = arith.constant 0 : index
    %c2_172 = arith.constant 2 : index
    %137 = vector.load %arg12[%c0_171, %c2_172] : memref<8x362xf32, #tpu.memory_space<vmem>>, vector<8x324xf32>
    %c16_173 = arith.constant 16 : index
    %c0_174 = arith.constant 0 : index
    %138 = vector.load %arg13[%c16_173, %c0_174] : memref<72x324xf32, #tpu.memory_space<vmem>>, vector<8x324xf32>
    tpu.vector_store %arg13[%c16_173, %c0_174], %137 {strides = array<i32>} : memref<72x324xf32, #tpu.memory_space<vmem>>, vector<8x324xf32>,
    %c0_175 = arith.constant 0 : index
    %c18_176 = arith.constant 18 : index
    %139 = vector.load %arg12[%c0_175, %c18_176] : memref<8x362xf32, #tpu.memory_space<vmem>>, vector<8x324xf32>
    %c24_177 = arith.constant 24 : index
    %c0_178 = arith.constant 0 : index
    %140 = vector.load %arg13[%c24_177, %c0_178] : memref<72x324xf32, #tpu.memory_space<vmem>>, vector<8x324xf32>
    tpu.vector_store %arg13[%c24_177, %c0_178], %139 {strides = array<i32>} : memref<72x324xf32, #tpu.memory_space<vmem>>, vector<8x324xf32>,
    %c0_179 = arith.constant 0 : index
    %c19_180 = arith.constant 19 : index
    %141 = vector.load %arg12[%c0_179, %c19_180] : memref<8x362xf32, #tpu.memory_space<vmem>>, vector<8x324xf32>
    %c32_181 = arith.constant 32 : index
    %c0_182 = arith.constant 0 : index
    %142 = vector.load %arg13[%c32_181, %c0_182] : memref<72x324xf32, #tpu.memory_space<vmem>>, vector<8x324xf32>
    tpu.vector_store %arg13[%c32_181, %c0_182], %141 {strides = array<i32>} : memref<72x324xf32, #tpu.memory_space<vmem>>, vector<8x324xf32>,
    %c0_183 = arith.constant 0 : index
    %c20_184 = arith.constant 20 : index
    %143 = vector.load %arg12[%c0_183, %c20_184] : memref<8x362xf32, #tpu.memory_space<vmem>>, vector<8x324xf32>
    %c40_185 = arith.constant 40 : index
    %c0_186 = arith.constant 0 : index
    %144 = vector.load %arg13[%c40_185, %c0_186] : memref<72x324xf32, #tpu.memory_space<vmem>>, vector<8x324xf32>
    tpu.vector_store %arg13[%c40_185, %c0_186], %143 {strides = array<i32>} : memref<72x324xf32, #tpu.memory_space<vmem>>, vector<8x324xf32>,
    %c0_187 = arith.constant 0 : index
    %c36_188 = arith.constant 36 : index
    %145 = vector.load %arg12[%c0_187, %c36_188] : memref<8x362xf32, #tpu.memory_space<vmem>>, vector<8x324xf32>
    %c48_189 = arith.constant 48 : index
    %c0_190 = arith.constant 0 : index
    %146 = vector.load %arg13[%c48_189, %c0_190] : memref<72x324xf32, #tpu.memory_space<vmem>>, vector<8x324xf32>
    tpu.vector_store %arg13[%c48_189, %c0_190], %145 {strides = array<i32>} : memref<72x324xf32, #tpu.memory_space<vmem>>, vector<8x324xf32>,
    %c0_191 = arith.constant 0 : index
    %c37_192 = arith.constant 37 : index
    %147 = vector.load %arg12[%c0_191, %c37_192] : memref<8x362xf32, #tpu.memory_space<vmem>>, vector<8x324xf32>
    %c56_193 = arith.constant 56 : index
    %c0_194 = arith.constant 0 : index
    %148 = vector.load %arg13[%c56_193, %c0_194] : memref<72x324xf32, #tpu.memory_space<vmem>>, vector<8x324xf32>
    tpu.vector_store %arg13[%c56_193, %c0_194], %147 {strides = array<i32>} : memref<72x324xf32, #tpu.memory_space<vmem>>, vector<8x324xf32>,
    %c0_195 = arith.constant 0 : index
    %c38_196 = arith.constant 38 : index
    %149 = vector.load %arg12[%c0_195, %c38_196] : memref<8x362xf32, #tpu.memory_space<vmem>>, vector<8x324xf32>
    %c64_197 = arith.constant 64 : index
    %c0_198 = arith.constant 0 : index
    %150 = vector.load %arg13[%c64_197, %c0_198] : memref<72x324xf32, #tpu.memory_space<vmem>>, vector<8x324xf32>
    tpu.vector_store %arg13[%c64_197, %c0_198], %149 {strides = array<i32>} : memref<72x324xf32, #tpu.memory_space<vmem>>, vector<8x324xf32>,
    %c0_199 = arith.constant 0 : index
    %c0_200 = arith.constant 0 : index
    %151 = vector.load %arg4[%c0_199, %c0_200] : memref<8x72xf32, #tpu.memory_space<vmem>>, vector<8x72xf32>
    %c0_201 = arith.constant 0 : index
    %c0_202 = arith.constant 0 : index
    %152 = vector.load %arg13[%c0_201, %c0_202] : memref<72x324xf32, #tpu.memory_space<vmem>>, vector<72x324xf32>
    %cst_203 = arith.constant dense<0.000000e+00> : vector<8x324xf32>
    %153 = tpu.matmul %151, %152, %cst_203 {dimension_numbers = #tpu.dot_dimension_numbers<[1], [0], [0], [1], [0, 0, 1, 1], [], []>} : vector<8x72xf32>, vector<72x324xf32>, vector<8x324xf32> -> vector<8x324xf32>
    %c2_204 = arith.constant 2 : index
    %c0_205 = arith.constant 0 : index
    %c0_206 = arith.constant 0 : index
    %154 = vector.load %arg6[%c2_204, %c0_205, %c0_206] : memref<4x8x1xf32, #tpu.memory_space<vmem>>, vector<1x8x1xf32>
    %155 = vector.shape_cast %154 : vector<1x8x1xf32> to vector<8x1xf32>
    %156 = vector.broadcast %155 : vector<8x1xf32> to vector<8x324xf32>
    %157 = arith.mulf %153, %156 : vector<8x324xf32>
    %c2_207 = arith.constant 2 : index
    %c0_208 = arith.constant 0 : index
    %c0_209 = arith.constant 0 : index
    %158 = vector.load %arg7[%c2_207, %c0_208, %c0_209] : memref<4x8x1xf32, #tpu.memory_space<vmem>>, vector<1x8x1xf32>
    %159 = vector.shape_cast %158 : vector<1x8x1xf32> to vector<8x1xf32>
    %160 = vector.broadcast %159 : vector<8x1xf32> to vector<8x324xf32>
    %161 = arith.addf %157, %160 : vector<8x324xf32>
    %c0_210 = arith.constant 0 : index
    %c0_211 = arith.constant 0 : index
    %162 = vector.load %arg5[%c0_210, %c0_211] : memref<8x4xf32, #tpu.memory_space<vmem>>, vector<8x4xf32>
    %c0_212 = arith.constant 0 : index
    %c19_213 = arith.constant 19 : index
    %163 = vector.load %arg11[%c0_212, %c19_213] : memref<4x362xf32, #tpu.memory_space<vmem>>, vector<4x324xf32>
    %cst_214 = arith.constant dense<0.000000e+00> : vector<8x324xf32>
    %164 = tpu.matmul %162, %163, %cst_214 {dimension_numbers = #tpu.dot_dimension_numbers<[1], [0], [0], [1], [0, 0, 1, 1], [], []>} : vector<8x4xf32>, vector<4x324xf32>, vector<8x324xf32> -> vector<8x324xf32>
    %c3_215 = arith.constant 3 : index
    %c0_216 = arith.constant 0 : index
    %c0_217 = arith.constant 0 : index
    %165 = vector.load %arg6[%c3_215, %c0_216, %c0_217] : memref<4x8x1xf32, #tpu.memory_space<vmem>>, vector<1x8x1xf32>
    %166 = vector.shape_cast %165 : vector<1x8x1xf32> to vector<8x1xf32>
    %167 = vector.broadcast %166 : vector<8x1xf32> to vector<8x324xf32>
    %168 = arith.mulf %164, %167 : vector<8x324xf32>
    %c3_218 = arith.constant 3 : index
    %c0_219 = arith.constant 0 : index
    %c0_220 = arith.constant 0 : index
    %169 = vector.load %arg7[%c3_218, %c0_219, %c0_220] : memref<4x8x1xf32, #tpu.memory_space<vmem>>, vector<1x8x1xf32>
    %170 = vector.shape_cast %169 : vector<1x8x1xf32> to vector<8x1xf32>
    %171 = vector.broadcast %170 : vector<8x1xf32> to vector<8x324xf32>
    %172 = arith.addf %168, %171 : vector<8x324xf32>
    %173 = arith.addf %161, %172 : vector<8x324xf32>
    %cst_221 = arith.constant 0.000000e+00 : f32
    %174 = vector.broadcast %cst_221 : f32 to vector<8x324xf32>
    %175 = arith.subf %174, %173 : vector<8x324xf32>
    %176 = math.exp %175 : vector<8x324xf32>
    %cst_222 = arith.constant 1.000000e+00 : f32
    %177 = vector.broadcast %cst_222 : f32 to vector<8x324xf32>
    %178 = arith.addf %177, %176 : vector<8x324xf32>
    %cst_223 = arith.constant 1.000000e+00 : f32
    %179 = vector.broadcast %cst_223 : f32 to vector<8x324xf32>
    %180 = arith.divf %179, %178 : vector<8x324xf32>
    %181 = arith.mulf %173, %180 : vector<8x324xf32>
    %c0_224 = arith.constant 0 : index
    %c19_225 = arith.constant 19 : index
    %182 = vector.load %arg12[%c0_224, %c19_225] : memref<8x362xf32, #tpu.memory_space<vmem>>, vector<8x324xf32>
    tpu.vector_store %arg12[%c0_224, %c19_225], %181 {strides = array<i32>} : memref<8x362xf32, #tpu.memory_space<vmem>>, vector<8x324xf32>,
    %c0_226 = arith.constant 0 : index
    %c20_227 = arith.constant 20 : index
    %183 = vector.load %arg12[%c0_226, %c20_227] : memref<8x362xf32, #tpu.memory_space<vmem>>, vector<8x324xf32>
    %184 = arith.maximumf %181, %183 : vector<8x324xf32>
    %c0_228 = arith.constant 0 : index
    %c37_229 = arith.constant 37 : index
    %185 = vector.load %arg12[%c0_228, %c37_229] : memref<8x362xf32, #tpu.memory_space<vmem>>, vector<8x324xf32>
    %186 = arith.maximumf %184, %185 : vector<8x324xf32>
    %c0_230 = arith.constant 0 : index
    %c38_231 = arith.constant 38 : index
    %187 = vector.load %arg12[%c0_230, %c38_231] : memref<8x362xf32, #tpu.memory_space<vmem>>, vector<8x324xf32>
    %188 = arith.maximumf %186, %187 : vector<8x324xf32>
    %c0_232 = arith.constant 0 : index
    %c0_233 = arith.constant 0 : index
    %189 = vector.load %arg9[%c0_232, %c0_233] : memref<324x64xf32, #tpu.memory_space<vmem>>, vector<324x64xf32>
    %cst_234 = arith.constant dense<0.000000e+00> : vector<8x64xf32>
    %190 = tpu.matmul %188, %189, %cst_234 {dimension_numbers = #tpu.dot_dimension_numbers<[1], [0], [0], [1], [0, 0, 1, 1], [], []>} : vector<8x324xf32>, vector<324x64xf32>, vector<8x64xf32> -> vector<8x64xf32>
    %c0_235 = arith.constant 0 : index
    %c0_236 = arith.constant 0 : index
    %c0_237 = arith.constant 0 : index
    %191 = vector.load %arg10[%c0_235, %c0_236, %c0_237] : memref<1x8x64xf32, #tpu.memory_space<vmem>>, vector<1x8x64xf32>
    %192 = vector.shape_cast %191 : vector<1x8x64xf32> to vector<8x64xf32>
    %193 = vector.shape_cast %190 : vector<8x64xf32> to vector<1x8x64xf32>
    tpu.vector_store %arg10[%c0_235, %c0_236, %c0_237], %193 {strides = array<i32>} : memref<1x8x64xf32, #tpu.memory_space<vmem>>, vector<1x8x64xf32>,
    return
  }
  func.func @transform_0(%arg0: i32) -> (i32, i32, i32, i32) {
    %c0_i32 = arith.constant 0 : i32
    %c0_i32_0 = arith.constant 0 : i32
    %c0_i32_1 = arith.constant 0 : i32
    %c0_i32_2 = arith.constant 0 : i32
    return %arg0, %c0_i32, %c0_i32_0, %c0_i32_1 : i32, i32, i32, i32
  }
  func.func @transform_1(%arg0: i32) -> (i32, i32) {
    %c0_i32 = arith.constant 0 : i32
    %c0_i32_0 = arith.constant 0 : i32
    %c0_i32_1 = arith.constant 0 : i32
    return %c0_i32, %c0_i32_0 : i32, i32
  }
  func.func @transform_2(%arg0: i32) -> (i32, i32) {
    %c0_i32 = arith.constant 0 : i32
    %c0_i32_0 = arith.constant 0 : i32
    %c0_i32_1 = arith.constant 0 : i32
    return %c0_i32, %c0_i32_0 : i32, i32
  }
  func.func @transform_3(%arg0: i32) -> (i32, i32) {
    %c0_i32 = arith.constant 0 : i32
    %c0_i32_0 = arith.constant 0 : i32
    %c0_i32_1 = arith.constant 0 : i32
    return %c0_i32, %c0_i32_0 : i32, i32
  }
  func.func @transform_4(%arg0: i32) -> (i32, i32) {
    %c0_i32 = arith.constant 0 : i32
    %c0_i32_0 = arith.constant 0 : i32
    %c0_i32_1 = arith.constant 0 : i32
    return %c0_i32, %c0_i32_0 : i32, i32
  }
  func.func @transform_5(%arg0: i32) -> (i32, i32, i32) {
    %c0_i32 = arith.constant 0 : i32
    %c0_i32_0 = arith.constant 0 : i32
    %c0_i32_1 = arith.constant 0 : i32
    %c0_i32_2 = arith.constant 0 : i32
    return %c0_i32, %c0_i32_0, %c0_i32_1 : i32, i32, i32
  }
  func.func @transform_6(%arg0: i32) -> (i32, i32, i32) {
    %c0_i32 = arith.constant 0 : i32
    %c0_i32_0 = arith.constant 0 : i32
    %c0_i32_1 = arith.constant 0 : i32
    %c0_i32_2 = arith.constant 0 : i32
    return %c0_i32, %c0_i32_0, %c0_i32_1 : i32, i32, i32
  }
  func.func @transform_7(%arg0: i32) -> (i32, i32) {
    %c0_i32 = arith.constant 0 : i32
    %c0_i32_0 = arith.constant 0 : i32
    %c0_i32_1 = arith.constant 0 : i32
    return %c0_i32, %c0_i32_0 : i32, i32
  }
  func.func @transform_8(%arg0: i32) -> (i32, i32) {
    %c0_i32 = arith.constant 0 : i32
    %c0_i32_0 = arith.constant 0 : i32
    %c0_i32_1 = arith.constant 0 : i32
    return %c0_i32, %c0_i32_0 : i32, i32
  }
  func.func @transform_9(%arg0: i32) -> (i32, i32, i32) {
    %c0_i32 = arith.constant 0 : i32
    %c0_i32_0 = arith.constant 0 : i32
    %c0_i32_1 = arith.constant 0 : i32
    return %arg0, %c0_i32, %c0_i32_0 : i32, i32, i32
  }
}

</mosaic_0001>

<bundles_post_ra>
// kernel: tpu_custom_call.1
= control target key start
LH: loop header
LB: loop body
LE: loop exit
PB: predicated region body
PF: predicated region fallthrough
CT: control target
= control target key end

     0   :  { %14 = vsyncpa [#allocation6], 0  ;;  %s3707_s0 = inlined_call_operand.vmem [shape: f32[2,4,16,16], index: 0, kind: input, shape index: {}]   ;;  %s3708_s1 = inlined_call_operand.vmem [shape: f32[8,36], index: 1, kind: input, shape index: {}]   ;;  %s3709_s2 = inlined_call_operand.vmem [shape: f32[8,72], index: 2, kind: input, shape index: {}]   ;;  %s3710_s3 = inlined_call_operand.vmem [shape: f32[8,72], index: 3, kind: input, shape index: {}]   ;;  %s3711_s4 = inlined_call_operand.vmem [shape: f32[8,4], index: 4, kind: input, shape index: {}]   ;;  %s3712_s5 = inlined_call_operand.vmem [shape: f32[4,8,1], index: 5, kind: input, shape index: {}]   ;;  %s3713_s6 = inlined_call_operand.vmem [shape: f32[4,8,1], index: 6, kind: input, shape index: {}]   ;;  %s3714_s7 = inlined_call_operand.vmem [shape: f32[1,324], index: 7, kind: input, shape index: {}]   ;;  %s3715_s8 = inlined_call_operand.vmem [shape: f32[324,64], index: 8, kind: input, shape index: {}]   ;;  %s3716_s9 = inlined_call_operand.hbm [shape: f32[2,8,64], index: 9, kind: output, shape index: {}]  }
   0x1   :  { %16 = vsyncpa [#allocation6 + $0x1], 0  ;;  %s2980_s30 = smov 0   ;;  %s2982_s10 = smov 0  }
   0x2   :  { %s2984_s11 = smov 0   ;;  %s2986_s12 = smov 0  }
   0x3 LB: > { %s3001_s13 = sadd.s32 4294967295, %s2904_s12   ;;  %s2417_s14 = sadd.s32 4294967294, %s2904_s12   ;;  %s2904_s12 = sphi %s2986_s12, %s3731_s12   ;;  %s2900_s11 = sphi %s2984_s11, %s3730_s11   ;;  %s2896_s10 = sphi %s2982_s10, %s3729_s10   ;;  %s2892_s30 = sphi %s2980_s30, %s3728_s30  }
   0x4   : > { %s3005_s15 = sadd.s32 1, %s2904_s12   ;;  %s223_s16 = sadd.s32 1, %s2900_s11 }
   0x5   : > { %s220_s17 = ssub.s32 %s2904_s12, %s3005_s15  ;;  %p233_p0 = scmp.ne.s32.totalorder %s2900_s11, %s2896_s10 }
   0x6   : > { %p221_p1 = scmp.eq.s32.totalorder %s220_s17, 0  ;;  %p234_p2 = scmp.eq.s32.totalorder %s3001_s13, 1 }
   0x7   : > { %p239_p3 = scmp.ne.s32.totalorder %s2896_s10, %s2892_s30  ;;  %p240_p4 = scmp.eq.s32.totalorder %s2417_s14, 1 }
   0x8   : > { %s3016_s18 = scalar_select %p221_p1, %s2900_s11, %s223_s16  }
   0x9   : > { %p3018_p5 = por %p234_p2, %p233_p0  ;;  %p3022_p6 = por %p240_p4, %p239_p3 }
   0xa   : > { %p2420_p7 = scmp.ge.s32.totalorder %s2904_s12, 1  ;;  %p290_p8 = scmp.lt.s32.totalorder %s2904_s12, 3 }
   0xc   : > { %p291_p9 = pnand %p2420_p7, %p290_p8 }
   0xd   : > { %p326_p10 = scmp.lt.s32.totalorder (!%p291_p9), %s3001_s13, 1  ;;  %v2906_v0 = vmov (!%p291_p9), 0.0   ;;  %vm347_vm0 = vcmask (!%p291_p9), 1041409   ;;  %vm349_vm1 = vcmask (!%p291_p9), 1045509   ;;  %vm352_vm2 = vcmask (!%p291_p9), 1042434   ;;  %s2907_s26 = smov (!%p291_p9), 54  }
   0xe   : > { %294 = sbr.rel (%p291_p9) target bundleno = 2162 (0x872), region = 56  ;;  %331 = vst [vmem:[#allocation2] sm:$0xff] (!%p291_p9), %v2906_v0  ;;  %334 = vst [vmem:[#allocation3] sm:$0xff] (!%p291_p9), %v2906_v0  ;;  %967 = vmatprep.mubr.f32.mxu1 (!%p291_p9), %v2906_v0  ;;  %1385 = vmatprep.mubr.f32.mxu0 (!%p291_p9), %v2906_v0  ;;  %vm354_vm3 = vcmask (!%p291_p9), 1046534   ;;  %vm357_vm4 = vcmask (!%p291_p9), 1043459   ;;  %vm359_vm5 = vcmask (!%p291_p9), 1047559  }
   0xf   : > { %s2908_s27 = smov (!%p291_p9), 18   ;;  %s2909_s28 = smov (!%p291_p9), 72   ;;  %vm472_vm6 = vcmask (!%p291_p9), 125952   ;;  %vm332_vm7 = vcmask (!%p291_p9), 863232   ;;  %vm494_vm8 = vcmask (!%p291_p9), 273552   ;;  %vm516_vm9 = vcmask (!%p291_p9), 421152  }
  0x10   : > { %s2910_s29 = smov (!%p291_p9), 36   ;;  %s3719_s14 = smov (!%p291_p9), 90   ;;  %333 = vst.msk [vmem:[#allocation2 + $0x8] sm:$0xf] (!%p291_p9), %vm332_vm7, %v2906_v0  ;;  %vm538_vm10 = vcmask (!%p291_p9), 568752   ;;  %vm560_vm11 = vcmask (!%p291_p9), 716352  }
  0x11   : > { %s2912_s16 = smov (!%p291_p9), 126   ;;  %s3717_s17 = smov (!%p291_p9), 108   ;;  %vm582_vm12 = vcmask (!%p291_p9), 863952   ;;  %vm629_vm13 = vcmask (!%p291_p9), 1044464   ;;  %vm630_vm14 = vcmask (!%p291_p9), 113668   ;;  %vm626_vm15 = vcmask (!%p291_p9), 1031168  }
  0x12   : > { %s2916_s23 = smov (!%p291_p9), 56   ;;  %s2917_s24 = smov (!%p291_p9), 92   ;;  %vm653_vm7 = vcmask (!%p291_p9), 257152  }
  0x15   : > { %s327_s21 = scalar_select %p326_p10, %s3001_s13, 1 }
  0x17   : > { %s2450_s22 = sshll.u32 %s327_s21, 6  ;;  %s2914_s21 = smov 38  }
  0x18   : > { %s3037_s25 = scalar_lea.vmem %s3707_s0, %s2450_s22  ;;  %s2915_s22 = smov 74  }
  0x19   : > { %v518_v1 = vld [vmem:[%s3037_s25 + $0x8] sm:$0x1]  ;;  %v519_v2 = vld [vmem:[%s3037_s25 + $0x18] sm:$0x1]  ;;  %v474_v7 = vld [vmem:[%s3037_s25 + $0x6] sm:$0x1] }
  0x1a   : > { %v520_v3 = vld [vmem:[%s3037_s25 + $0x28] sm:$0x1]  ;;  %v521_v4 = vld [vmem:[%s3037_s25 + $0x38] sm:$0x1]  ;;  %v526_v5 = vrot.slane %v519_v2, 7 }
  0x1b   : > { %v529_v6 = vrot.slane %v520_v3, 6  ;;  %v532_v8 = vrot.slane %v521_v4, 5  ;;  %v475_v9 = vld [vmem:[%s3037_s25 + $0x16] sm:$0x1]  ;;  %v476_v10 = vld [vmem:[%s3037_s25 + $0x26] sm:$0x1] }
  0x1c   : > { %v527_v11 = vsel %vm347_vm0, %v526_v5, %v518_v1  ;;  %v477_v12 = vld [vmem:[%s3037_s25 + $0x36] sm:$0x1]  ;;  %v482_v13 = vrot.slane %v475_v9, 7  ;;  %v485_v14 = vrot.slane %v476_v10, 6  ;;  %v540_v15 = vld [vmem:[%s3037_s25 + $0x9] sm:$0x1] }
  0x1d   : > { %v528_v16 = vsel %vm349_vm1, %v526_v5, %v527_v11  ;;  %v488_v17 = vrot.slane %v477_v12, 5  ;;  %v541_v18 = vld [vmem:[%s3037_s25 + $0x19] sm:$0x1]  ;;  %v542_v19 = vld [vmem:[%s3037_s25 + $0x29] sm:$0x1] }
  0x1e   : > { %v530_v20 = vsel %vm352_vm2, %v529_v6, %v528_v16  ;;  %v483_v21 = vsel %vm347_vm0, %v482_v13, %v474_v7  ;;  %v543_v22 = vld [vmem:[%s3037_s25 + $0x39] sm:$0x1]  ;;  %v548_v23 = vrot.slane %v541_v18, 7  ;;  %v551_v24 = vrot.slane %v542_v19, 6  ;;  %v496_v25 = vld [vmem:[%s3037_s25 + $0x7] sm:$0x1] }
  0x1f   : > { %v531_v26 = vsel %vm354_vm3, %v529_v6, %v530_v20  ;;  %v484_v27 = vsel %vm349_vm1, %v482_v13, %v483_v21  ;;  %v554_v28 = vrot.slane %v543_v22, 5  ;;  %v497_v29 = vld [vmem:[%s3037_s25 + $0x17] sm:$0x1]  ;;  %v498_v30 = vld [vmem:[%s3037_s25 + $0x27] sm:$0x1] }
  0x20   : > { %v533_v31 = vsel %vm357_vm4, %v532_v8, %v531_v26  ;;  %v486_v32 = vsel %vm352_vm2, %v485_v14, %v484_v27  ;;  %v549_v33 = vsel %vm347_vm0, %v548_v23, %v540_v15  ;;  %v499_v34 = vld [vmem:[%s3037_s25 + $0x37] sm:$0x1]  ;;  %v504_v35 = vrot.slane %v497_v29, 7  ;;  %v563_v40 = vld [vmem:[%s3037_s25 + $0x1a] sm:$0x1] }
  0x21   : > { %v534_v36 = vsel %vm359_vm5, %v532_v8, %v533_v31  ;;  %v487_v37 = vsel %vm354_vm3, %v485_v14, %v486_v32  ;;  %v550_v38 = vsel %vm349_vm1, %v548_v23, %v549_v33  ;;  %v507_v39 = vrot.slane %v498_v30, 6  ;;  %v564_v41 = vld [vmem:[%s3037_s25 + $0x2a] sm:$0x1]  ;;  %v565_v47 = vld [vmem:[%s3037_s25 + $0x3a] sm:$0x1] }
  0x22   : > { %535 = vrot.lane.b32.xlu1 %v534_v36, %s2907_s26  ;;  %v489_v42 = vsel %vm357_vm4, %v488_v17, %v487_v37  ;;  %v552_v43 = vsel %vm352_vm2, %v551_v24, %v550_v38  ;;  %v505_v44 = vsel %vm347_vm0, %v504_v35, %v496_v25  ;;  %v510_v45 = vrot.slane %v499_v34, 5  ;;  %v562_v46 = vld [vmem:[%s3037_s25 + $0xa] sm:$0x1]  ;;  %v607_v52 = vld [vmem:[%s3037_s25 + $0x1c] sm:$0x1]  ;;  %s2918_s26 = smov 110  }
  0x23   : > { %v490_v48 = vsel %vm359_vm5, %v488_v17, %v489_v42  ;;  %v553_v49 = vsel %vm354_vm3, %v551_v24, %v552_v43  ;;  %v506_v50 = vsel %vm349_vm1, %v504_v35, %v505_v44  ;;  %v570_v51 = vrot.slane %v563_v40, 7  ;;  %v608_v53 = vld [vmem:[%s3037_s25 + $0x2c] sm:$0x1]  ;;  %v609_v59 = vld [vmem:[%s3037_s25 + $0x3c] sm:$0x1] }
  0x24   : > { %491 = vrot.lane.b32.xlu0 %v490_v48, %s2908_s27  ;;  %v555_v54 = vsel %vm357_vm4, %v554_v28, %v553_v49  ;;  %v508_v55 = vsel %vm352_vm2, %v507_v39, %v506_v50  ;;  %v573_v56 = vrot.slane %v564_v41, 6  ;;  %v576_v57 = vrot.slane %v565_v47, 5  ;;  %v606_v58 = vld [vmem:[%s3037_s25 + $0xc] sm:$0x1]  ;;  %v585_v1 = vld [vmem:[%s3037_s25 + $0x1b] sm:$0x1] }
  0x25   : > { %v556_v60 = vsel %vm359_vm5, %v554_v28, %v555_v54  ;;  %v509_v61 = vsel %vm354_vm3, %v507_v39, %v508_v55  ;;  %v571_v62 = vsel %vm347_vm0, %v570_v51, %v562_v46  ;;  %v614_v63 = vrot.slane %v607_v52, 7  ;;  %v586_v2 = vld [vmem:[%s3037_s25 + $0x2b] sm:$0x1]  ;;  %v587_v8 = vld [vmem:[%s3037_s25 + $0x3b] sm:$0x1]  ;;  %s2919_s27 = smov 16  }
  0x26   : > { %557 = vrot.lane.b32.xlu1 %v556_v60, %s2909_s28  ;;  %v511_v3 = vsel %vm357_vm4, %v510_v45, %v509_v61  ;;  %v572_v4 = vsel %vm349_vm1, %v570_v51, %v571_v62  ;;  %v617_v5 = vrot.slane %v608_v53, 6  ;;  %v620_v6 = vrot.slane %v609_v59, 5  ;;  %v584_v7 = vld [vmem:[%s3037_s25 + $0xb] sm:$0x1]  ;;  %v339_v13 = vld [vmem:[%s3037_s25 + $0x10] sm:$0x1] }
  0x27   : > { %v512_v9 = vsel %vm359_vm5, %v510_v45, %v511_v3  ;;  %v574_v10 = vsel %vm352_vm2, %v573_v56, %v572_v4  ;;  %v615_v11 = vsel %vm347_vm0, %v614_v63, %v606_v58  ;;  %v592_v12 = vrot.slane %v585_v1, 7  ;;  %v340_v14 = vld [vmem:[%s3037_s25 + $0x20] sm:$0x1]  ;;  %v341_v20 = vld [vmem:[%s3037_s25 + $0x30] sm:$0x1]  ;;  %s2921_s28 = smov 52  }
  0x28   : > { %513 = vrot.lane.b32.xlu0 %v512_v9, %s2910_s29  ;;  %v575_v15 = vsel %vm354_vm3, %v573_v56, %v574_v10  ;;  %v616_v16 = vsel %vm349_vm1, %v614_v63, %v615_v11  ;;  %v595_v17 = vrot.slane %v586_v2, 6  ;;  %v598_v18 = vrot.slane %v587_v8, 5  ;;  %v338_v19 = vld [vmem:[%s3037_s25] sm:$0x1]  ;;  %v389_v25 = vld [vmem:[%s3037_s25 + $0x12] sm:$0x1] }
  0x29   : > { %v577_v21 = vsel %vm357_vm4, %v576_v57, %v575_v15  ;;  %v618_v22 = vsel %vm352_vm2, %v617_v5, %v616_v16  ;;  %v593_v23 = vsel %vm347_vm0, %v592_v12, %v584_v7  ;;  %v346_v24 = vrot.slane %v339_v13, 7  ;;  %v390_v30 = vld [vmem:[%s3037_s25 + $0x22] sm:$0x1]  ;;  %v391_v31 = vld [vmem:[%s3037_s25 + $0x32] sm:$0x1]  ;;  %s2922_s29 = smov 127  }
  0x2a   : > { %v578_v26 = vsel %vm359_vm5, %v576_v57, %v577_v21  ;;  %v619_v27 = vsel %vm354_vm3, %v617_v5, %v618_v22  ;;  %v594_v28 = vsel %vm349_vm1, %v592_v12, %v593_v23  ;;  %v351_v29 = vrot.slane %v340_v14, 6  ;;  %v388_v36 = vld [vmem:[%s3037_s25 + $0x2] sm:$0x1]  ;;  %v367_v37 = vld [vmem:[%s3037_s25 + $0x11] sm:$0x1] }
  0x2b   : > { %579 = vrot.lane.b32.xlu1 %v578_v26, %s3719_s14  ;;  %v621_v32 = vsel %vm357_vm4, %v620_v6, %v619_v27  ;;  %v596_v33 = vsel %vm352_vm2, %v595_v17, %v594_v28  ;;  %v348_v34 = vsel %vm347_vm0, %v346_v24, %v338_v19  ;;  %v356_v35 = vrot.slane %v341_v20, 5  ;;  %v368_v42 = vld [vmem:[%s3037_s25 + $0x21] sm:$0x1]  ;;  %v369_v43 = vld [vmem:[%s3037_s25 + $0x31] sm:$0x1] }
  0x2c   : > { %v622_v38 = vsel %vm359_vm5, %v620_v6, %v621_v32  ;;  %v597_v39 = vsel %vm354_vm3, %v595_v17, %v596_v33  ;;  %v350_v40 = vsel %vm349_vm1, %v346_v24, %v348_v34  ;;  %v396_v41 = vrot.slane %v389_v25, 7  ;;  %v366_v48 = vld [vmem:[%s3037_s25 + $0x1] sm:$0x1]  ;;  %v411_v49 = vld [vmem:[%s3037_s25 + $0x13] sm:$0x1] }
  0x2d   : > { %623 = vrot.lane.b32.xlu0 %v622_v38, %s2912_s16  ;;  %v599_v44 = vsel %vm357_vm4, %v598_v18, %v597_v39  ;;  %v353_v45 = vsel %vm352_vm2, %v351_v29, %v350_v40  ;;  %v399_v46 = vrot.slane %v390_v30, 6  ;;  %v402_v47 = vrot.slane %v391_v31, 5  ;;  %v412_v54 = vld [vmem:[%s3037_s25 + $0x23] sm:$0x1]  ;;  %v413_v55 = vld [vmem:[%s3037_s25 + $0x33] sm:$0x1] }
  0x2e   : > { %v600_v50 = vsel %vm359_vm5, %v598_v18, %v599_v44  ;;  %v355_v51 = vsel %vm354_vm3, %v351_v29, %v353_v45  ;;  %v397_v52 = vsel %vm347_vm0, %v396_v41, %v388_v36  ;;  %v374_v53 = vrot.slane %v367_v37, 7  ;;  %v410_v60 = vld [vmem:[%s3037_s25 + $0x3] sm:$0x1]  ;;  %v433_v61 = vld [vmem:[%s3037_s25 + $0x14] sm:$0x1] }
  0x2f   : > { %601 = vrot.lane.b32.xlu1 %v600_v50, %s3717_s17  ;;  %v358_v56 = vsel %vm357_vm4, %v356_v35, %v355_v51  ;;  %v398_v57 = vsel %vm349_vm1, %v396_v41, %v397_v52  ;;  %v377_v58 = vrot.slane %v368_v42, 6  ;;  %v380_v59 = vrot.slane %v369_v43, 5  ;;  %v434_v3 = vld [vmem:[%s3037_s25 + $0x24] sm:$0x1]  ;;  %v435_v9 = vld [vmem:[%s3037_s25 + $0x34] sm:$0x1] }
  0x30   : > { %v360_v62 = vsel %vm359_vm5, %v356_v35, %v358_v56  ;;  %v400_v63 = vsel %vm352_vm2, %v399_v46, %v398_v57  ;;  %v375_v1 = vsel %vm347_vm0, %v374_v53, %v366_v48  ;;  %v418_v2 = vrot.slane %v411_v49, 7  ;;  %v432_v8 = vld [vmem:[%s3037_s25 + $0x4] sm:$0x1]  ;;  %v634_v14 = vld [vmem:[%s3037_s25 + $0x1d] sm:$0x1] }
  0x31   : > { %361 = vrot.lane.b32.xlu0 %v360_v62, %s2914_s21  ;;  %v401_v4 = vsel %vm354_vm3, %v399_v46, %v400_v63  ;;  %v376_v5 = vsel %vm349_vm1, %v374_v53, %v375_v1  ;;  %v421_v6 = vrot.slane %v412_v54, 6  ;;  %v424_v7 = vrot.slane %v413_v55, 5  ;;  %v635_v19 = vld [vmem:[%s3037_s25 + $0x2d] sm:$0x1]  ;;  %v636_v20 = vld [vmem:[%s3037_s25 + $0x3d] sm:$0x1] }
  0x32   : > { %v403_v10 = vsel %vm357_vm4, %v402_v47, %v401_v4  ;;  %v378_v11 = vsel %vm352_vm2, %v377_v58, %v376_v5  ;;  %v419_v12 = vsel %vm347_vm0, %v418_v2, %v410_v60  ;;  %v440_v13 = vrot.slane %v433_v61, 7  ;;  %v633_v25 = vld [vmem:[%s3037_s25 + $0xd] sm:$0x1]  ;;  %v656_v26 = vld [vmem:[%s3037_s25 + $0x1e] sm:$0x1]  ;;  %s3721_s21 = smov 91  }
  0x33   : > { %v404_v15 = vsel %vm359_vm5, %v402_v47, %v403_v10  ;;  %v379_v16 = vsel %vm354_vm3, %v377_v58, %v378_v11  ;;  %v420_v17 = vsel %vm349_vm1, %v418_v2, %v419_v12  ;;  %v443_v18 = vrot.slane %v434_v3, 6  ;;  %v657_v31 = vld [vmem:[%s3037_s25 + $0x2e] sm:$0x1]  ;;  %v658_v32 = vld [vmem:[%s3037_s25 + $0x3e] sm:$0x1] }
  0x34   : > { %405 = vrot.lane.b32.xlu1 %v404_v15, %s2915_s22  ;;  %v381_v21 = vsel %vm357_vm4, %v380_v59, %v379_v16  ;;  %v422_v22 = vsel %vm352_vm2, %v421_v6, %v420_v17  ;;  %v441_v23 = vsel %vm347_vm0, %v440_v13, %v432_v8  ;;  %v446_v24 = vrot.slane %v435_v9, 5  ;;  %v655_v37 = vld [vmem:[%s3037_s25 + $0xe] sm:$0x1]  ;;  %v678_v38 = vld [vmem:[%s3037_s25 + $0x1f] sm:$0x1]  ;;  %s2924_s22 = smov 109  }
  0x35   : > { %v382_v27 = vsel %vm359_vm5, %v380_v59, %v381_v21  ;;  %v423_v28 = vsel %vm354_vm3, %v421_v6, %v422_v22  ;;  %v442_v29 = vsel %vm349_vm1, %v440_v13, %v441_v23  ;;  %v641_v30 = vrot.slane %v634_v14, 7  ;;  %v679_v43 = vld [vmem:[%s3037_s25 + $0x2f] sm:$0x1]  ;;  %v680_v44 = vld [vmem:[%s3037_s25 + $0x3f] sm:$0x1] }
  0x36   : > { %383 = vrot.lane.b32.xlu0 %v382_v27, %s2916_s23  ;;  %v425_v33 = vsel %vm357_vm4, %v424_v7, %v423_v28  ;;  %v444_v34 = vsel %vm352_vm2, %v443_v18, %v442_v29  ;;  %v644_v35 = vrot.slane %v635_v19, 6  ;;  %v647_v36 = vrot.slane %v636_v20, 5  ;;  %v677_v49 = vld [vmem:[%s3037_s25 + $0xf] sm:$0x1]  ;;  %v455_v50 = vld [vmem:[%s3037_s25 + $0x15] sm:$0x1] }
  0x37   : > { %v426_v39 = vsel %vm359_vm5, %v424_v7, %v425_v33  ;;  %v445_v40 = vsel %vm354_vm3, %v443_v18, %v444_v34  ;;  %v642_v41 = vsel %vm347_vm0, %v641_v30, %v633_v25  ;;  %v663_v42 = vrot.slane %v656_v26, 7  ;;  %v456_v55 = vld [vmem:[%s3037_s25 + $0x25] sm:$0x1]  ;;  %v457_v61 = vld [vmem:[%s3037_s25 + $0x35] sm:$0x1]  ;;  %s2928_s23 = smov 19  }
  0x38   : > { %427 = vrot.lane.b32.xlu1 %v426_v39, %s2917_s24  ;;  %v447_v45 = vsel %vm357_vm4, %v446_v24, %v445_v40  ;;  %v643_v46 = vsel %vm349_vm1, %v641_v30, %v642_v41  ;;  %v666_v47 = vrot.slane %v657_v31, 6  ;;  %v669_v48 = vrot.slane %v658_v32, 5  ;;  %v454_v60 = vld [vmem:[%s3037_s25 + $0x5] sm:$0x1]  ;;  %s2920_s25 = smov 34  }
  0x39   : > { %v448_v51 = vsel %vm359_vm5, %v446_v24, %v447_v45  ;;  %v645_v52 = vsel %vm352_vm2, %v644_v35, %v643_v46  ;;  %v664_v53 = vsel %vm347_vm0, %v663_v42, %v655_v37  ;;  %v685_v54 = vrot.slane %v678_v38, 7 }
  0x3a   : > { %v646_v56 = vsel %vm354_vm3, %v644_v35, %v645_v52  ;;  %v665_v57 = vsel %vm349_vm1, %v663_v42, %v664_v53  ;;  %v688_v58 = vrot.slane %v679_v43, 6  ;;  %v691_v59 = vrot.slane %v680_v44, 5 }
  0x3b   : > { %v648_v62 = vsel %vm357_vm4, %v647_v36, %v646_v56  ;;  %v667_v63 = vsel %vm352_vm2, %v666_v47, %v665_v57  ;;  %v686_v1 = vsel %vm347_vm0, %v685_v54, %v677_v49  ;;  %v462_v2 = vrot.slane %v455_v50, 7  ;;  %v1044_v49 = vld [vmem:[%s3712_s5] sm:$0xff] }
  0x3c   : > { %449 = vrot.lane.b32.xlu1 %v448_v51, %s2918_s26  ;;  %v649_v3 = vsel %vm359_vm5, %v647_v36, %v648_v62  ;;  %v668_v4 = vsel %vm354_vm3, %v666_v47, %v667_v63  ;;  %v687_v5 = vsel %vm349_vm1, %v685_v54, %v686_v1  ;;  %v465_v6 = vrot.slane %v456_v55, 6  ;;  %v1053_v50 = vld [vmem:[%s3713_s6] sm:$0xff] }
  0x3d   : > { %650 = vrot.lane.b32.xlu0 %v649_v3, %s2919_s27  ;;  %v670_v7 = vsel %vm357_vm4, %v669_v48, %v668_v4  ;;  %v689_v8 = vsel %vm352_vm2, %v688_v58, %v687_v5  ;;  %v463_v9 = vsel %vm347_vm0, %v462_v2, %v454_v60  ;;  %v468_v10 = vrot.slane %v457_v61, 5 }
  0x3e   : > { %v671_v11 = vsel %vm359_vm5, %v669_v48, %v670_v7  ;;  %v690_v12 = vsel %vm354_vm3, %v688_v58, %v689_v8  ;;  %v464_v13 = vsel %vm349_vm1, %v462_v2, %v463_v9  ;;  %vm604_vm0 = vcmask 1011552   ;;  %vm631_vm1 = vmor %vm630_vm14, %vm629_vm13 }
  0x3f   : > { %v692_v14 = vsel %vm357_vm4, %v691_v59, %v690_v12  ;;  %v466_v15 = vsel %vm352_vm2, %v465_v6, %v464_v13  ;;  %vm364_vm2 = vcmask 437552   ;;  %v2925_v51 = vmov 0  }
  0x40   : > { %v467_v16 = vsel %vm354_vm3, %v465_v6, %v466_v15  ;;  %v693_v18 = vsel %vm359_vm5, %v691_v59, %v692_v14  ;;  %vm386_vm3 = vcmask 585152   ;;  %2781 = vset.pattern.permute.xlu1 %v2925_v51  ;;  %2782 = vset.pattern.permute.xlu0 %v2925_v51  ;;  %vm782_vm13 = vcmask 891904  }
  0x41   : > { %672 = vrot.lane.b32.xlu0 %v671_v11, %s2920_s25  ;;  %v469_v17 = vsel %vm357_vm4, %v468_v10, %v467_v16  ;;  %vm408_vm4 = vcmask 732752   ;;  %vm803_vm14 = vcmask 883712   ;;  %s3725_s25 = smov 108  }
  0x42   : > { %v470_v19 = vsel %vm359_vm5, %v468_v10, %v469_v17  ;;  %vm430_vm5 = vcmask 880352  }
  0x43   : > { %473 = vst.msk [vmem:[#allocation2 + $0x4] sm:$0xf] %vm472_vm6, %v470_v19  ;;  %vm452_vm6 = vcmask 1027952  }
  0x45   : > { %694 = vrot.lane.b32.xlu0 %v693_v18, %s2921_s28 }
  0x94   : > { %v536_v20 = vpop.permute.xlu1 %535 }
  0x96   : > { %v492_v21 = vpop.permute.xlu0 %491 }
  0x97   : > { %495 = vst.msk [vmem:[#allocation2 + $0x4] sm:$0xf] %vm494_vm8, %v492_v21  ;;  %vm675_vm8 = vcmask 404752  }
  0x98   : > { %v558_v22 = vpop.permute.xlu1 %557 }
  0x9a   : > { %v514_v23 = vpop.permute.xlu0 %513 }
  0x9b   : > { %517 = vst.msk [vmem:[#allocation2 + $0x4] sm:$0xf] %vm516_vm9, %v514_v23  ;;  %vm697_vm9 = vcmask 552352  }
  0x9c   : > { %539 = vst.msk [vmem:[#allocation2 + $0x4] sm:$0xf] %vm538_vm10, %v536_v20  ;;  %vm707_vm10 = vcmask 551936  }
  0x9d   : > { %v580_v24 = vpop.permute.xlu1 %579  ;;  %561 = vst.msk [vmem:[#allocation2 + $0x4] sm:$0xf] %vm560_vm11, %v558_v22  ;;  %vm721_vm11 = vcmask 1039360  }
  0x9e   : > { %583 = vst.msk [vmem:[#allocation2 + $0x4] sm:$0xf] %vm582_vm12, %v580_v24  ;;  %vm762_vm12 = vcmask 900096  }
  0x9f   : > { %v624_v25 = vpop.permute.xlu0 %623 }
  0xa0   : > { %v625_v26 = vrot.slane %v624_v25, 4 }
  0xa1   : > { %v602_v27 = vpop.permute.xlu1 %601 }
  0xa2   : > { %v627_v28 = vsel %vm626_vm15, %v625_v26, %v624_v25  ;;  %605 = vst.msk [vmem:[#allocation2 + $0x4] sm:$0xf] %vm604_vm0, %v602_v27  ;;  %vm823_vm0 = vcmask 752640  }
  0xa3   : > { %632 = vst.msk [vmem:[#allocation2 + $0x4] sm:$0xff] %vm631_vm1, %v627_v28  ;;  %v362_v29 = vpop.permute.xlu0 %361  ;;  %vm729_vm1 = vcmask 556036  }
  0xa4   : > { %365 = vst.msk [vmem:[#allocation2] sm:$0xf] %vm364_vm2, %v362_v29  ;;  %vm844_vm2 = vcmask 744448  }
  0xa6   : > { %v406_v30 = vpop.permute.xlu1 %405 }
  0xa8   : > { %v384_v31 = vpop.permute.xlu0 %383 }
  0xa9   : > { %387 = vst.msk [vmem:[#allocation2] sm:$0xf] %vm386_vm3, %v384_v31  ;;  %vm864_vm3 = vcmask 736256  }
  0xaa   : > { %v428_v32 = vpop.permute.xlu1 %427  ;;  %409 = vst.msk [vmem:[#allocation2] sm:$0xf] %vm408_vm4, %v406_v30  ;;  %vm893_vm4 = vcmask 1043456  }
  0xab   : > { %431 = vst.msk [vmem:[#allocation2] sm:$0xf] %vm430_vm5, %v428_v32  ;;  %vm889_vm5 = vcmask 293888  }
  0xae   : > { %v450_v33 = vpop.permute.xlu1 %449 }
  0xaf   : > { %453 = vst.msk [vmem:[#allocation2] sm:$0xf] %vm452_vm6, %v450_v33  ;;  %v651_v34 = vpop.permute.xlu0 %650  ;;  %vm2927_vm6 = vmmov 0  }
  0xb0   : > { %654 = vst.msk [vmem:[#allocation2 + $0x8] sm:$0xf] %vm653_vm7, %v651_v34  ;;  %vm336_vm7 = vcmask 867328  }
  0xb3   : > { %v673_v35 = vpop.permute.xlu0 %672 }
  0xb4   : > { %676 = vst.msk [vmem:[#allocation2 + $0x8] sm:$0xf] %vm675_vm8, %v673_v35  ;;  %vm1117_vm8 = vcmask 1047704  }
  0xb6   : > { %v700_v36 = vld [vmem:[#allocation2] sm:$0xff] }
  0xb7   : > { %705 = vst [vmem:[#allocation4] sm:$0xf] %v700_v36  ;;  %736 = vrot.lane.b32.xlu0 %v700_v36, %s2912_s16  ;;  %v735_v37 = vcombine.high %v700_v36, %v700_v36  ;;  %717 = vrot.lane.b32.xlu1 %v700_v36, %s2922_s29  ;;  %v695_v38 = vpop.permute.xlu0 %694  ;;  %v713_v39 = vcombine.low %v700_v36, %v700_v36 }
  0xb8   : > { %698 = vst.msk [vmem:[#allocation2 + $0x8] sm:$0xf] %vm697_vm9, %v695_v38  ;;  %vm1120_vm9 = vcmask 711680  }
  0xb9   : > { %706 = vst [vmem:[#allocation4 + $0x8] sm:$0xf] %v735_v37 }
  0xbb   : > { %799 = vrot.lane.b32.xlu0 %v700_v36, %s3717_s17  ;;  %758 = vrot.lane.b32.xlu1 %v700_v36, %s2918_s26 }
  0xbf   : > { %840 = vrot.lane.b32.xlu0 %v700_v36, %s3721_s21  ;;  %738 = vrot.lane.b32.xlu1 %v735_v37, %s2912_s16  ;;  %v701_v40 = vld [vmem:[#allocation2 + $0x8] sm:$0xf] }
  0xc0   : > { %708 = vst.msk [vmem:[#allocation4 + $0x10] sm:$0xf] %vm707_vm10, %v701_v40  ;;  %v772_v41 = vld [vmem:[#allocation2 + $0x8] sm:$0xf] }
  0xc1   : > { %v732_v42 = vld [vmem:[#allocation2 + $0x8] sm:$0xf] }
  0xc2   : > { %v2800_v43 = vld [vmem:[#allocation2 + $0x8] ss:$0 sps:$4 sm:$0xff]  }
  0xc3   : > { %776 = vrot.lane.b32.xlu0 %v700_v36, %s2924_s22  ;;  %715 = vrot.lane.b32.xlu1 %v713_v39, %s2922_s29  ;;  %v813_v44 = vld [vmem:[#allocation2 + $0x8] sm:$0xf] }
  0xc4   : > { %v2801_v45 = vld [vmem:[#allocation2 + $0x8] ss:$0 sps:$4 sm:$0xff]  }
  0xc5   : > { %v2802_v46 = vld [vmem:[#allocation2 + $0x8] ss:$0 sps:$4 sm:$0xff]  }
  0xc6   : > { %v2803_v47 = vld [vmem:[#allocation2 + $0x8] ss:$0 sps:$4 sm:$0xff]  }
  0xc7   : > { %778 = vrot.lane.b32.xlu0 %v735_v37, %s2924_s22  ;;  %756 = vrot.lane.b32.xlu1 %v713_v39, %s2918_s26  ;;  %v854_v48 = vld [vmem:[#allocation2 + $0x8] sm:$0xf] }
  0xcb   : > { %819 = vrot.lane.b32.xlu0 %v735_v37, %s2917_s24  ;;  %797 = vrot.lane.b32.xlu1 %v713_v39, %s3717_s17 }
  0xcf   : > { %780 = vrot.lane.b32.xlu1 %v772_v41, %s2924_s22  ;;  %740 = vrot.lane.b32.xlu0 %v732_v42, %s2912_s16 }
  0xd3   : > { %821 = vrot.lane.b32.xlu1 %v813_v44, %s2917_s24  ;;  %719 = vrot.lane.b32.xlu0 %v2800_v43, %s2922_s29  ;;  %v873_v43 = vld [vmem:[%s3708_s1] sm:$0xff] }
  0xd7   : > { %801 = vrot.lane.b32.xlu1 %v2801_v45, %s3717_s17  ;;  %760 = vrot.lane.b32.xlu0 %v2802_v46, %s2918_s26 }
  0xdb   : > { %842 = vrot.lane.b32.xlu1 %v2803_v47, %s3721_s21  ;;  %817 = vrot.lane.b32.xlu0 %v700_v36, %s2917_s24  ;;  %v2926_v47 = vmov 0.0|0.0  }
  0xdf   : > { %838 = vrot.lane.b32.xlu1 %v713_v39, %s3721_s21  ;;  %860 = vrot.lane.b32.xlu0 %v735_v37, %s3719_s14 }
  0xe3   : > { %862 = vrot.lane.b32.xlu1 %v854_v48, %s3719_s14  ;;  %858 = vrot.lane.b32.xlu0 %v700_v36, %s3719_s14 }
  0xe7   : > { %1047 = vperm.xlu1 %2781, %v1044_v49   ;;  %1056 = vperm.xlu0 %2782, %v1053_v50  }
 0x129   : > { %v718_v52 = vpop.permute.xlu1 %717  ;;  %v737_v53 = vpop.permute.xlu0 %736 }
 0x12d   : > { %v759_v54 = vpop.permute.xlu1 %758  ;;  %v800_v55 = vpop.permute.xlu0 %799 }
 0x131   : > { %v739_v56 = vpop.permute.xlu1 %738  ;;  %v841_v57 = vpop.permute.xlu0 %840 }
 0x132   : > { %v742_v58 = vsel %vm626_vm15, %v737_v53, %v739_v56 }
 0x133   : > { %747 = vst [vmem:[#allocation4 + $0x18] sm:$0xf] %v742_v58 }
 0x135   : > { %v716_v59 = vpop.permute.xlu1 %715  ;;  %v777_v60 = vpop.permute.xlu0 %776 }
 0x136   : > { %v722_v61 = vsel %vm721_vm11, %v716_v59, %v718_v52 }
 0x137   : > { %727 = vst [vmem:[#allocation4] sm:$0xf0] %v722_v61 }
 0x139   : > { %v757_v62 = vpop.permute.xlu1 %756  ;;  %v779_v63 = vpop.permute.xlu0 %778 }
 0x13a   : > { %v763_v1 = vsel %vm762_vm12, %v757_v62, %v759_v54  ;;  %v783_v2 = vsel %vm782_vm13, %v777_v60, %v779_v63 }
 0x13b   : > { %768 = vst [vmem:[#allocation4 + $0x18] sm:$0xf0] %v763_v1  ;;  %788 = vst [vmem:[#allocation4 + $0x30] sm:$0xf] %v783_v2 }
 0x13d   : > { %v798_v3 = vpop.permute.xlu1 %797  ;;  %v820_v4 = vpop.permute.xlu0 %819 }
 0x13e   : > { %v804_v5 = vsel %vm803_vm14, %v798_v3, %v800_v55  ;;  %v874_v29 = vld [vmem:[#allocation4] sm:$0xff] }
 0x13f   : > { %809 = vst [vmem:[#allocation4 + $0x30] sm:$0xf0] %v804_v5 }
 0x141   : > { %v781_v6 = vpop.permute.xlu1 %780  ;;  %v741_v7 = vpop.permute.xlu0 %740 }
 0x142   : > { %v784_v8 = vsel %vm782_vm13, %v779_v63, %v781_v6  ;;  %790 = vst.msk [vmem:[#allocation4 + $0x40] sm:$0xf] %vm707_vm10, %v781_v6  ;;  %v743_v9 = vsel %vm626_vm15, %v739_v56, %v741_v7  ;;  %749 = vst.msk [vmem:[#allocation4 + $0x28] sm:$0xf] %vm707_vm10, %v741_v7  ;;  %v877_v24 = vld [vmem:[#allocation4 + $0x18] sm:$0xff]  ;;  %v1084_v7 = vlaneseq }
 0x143   : > { %789 = vst [vmem:[#allocation4 + $0x38] sm:$0xf] %v784_v8  ;;  %748 = vst [vmem:[#allocation4 + $0x20] sm:$0xf] %v743_v9  ;;  %v2607_v30 = vpack.c.bf16 %v877_v24, %v874_v29 }
 0x145   : > { %v822_v10 = vpop.permute.xlu1 %821  ;;  %v720_v11 = vpop.permute.xlu0 %719 }
 0x146   : > { %v825_v12 = vsel %vm823_vm0, %v820_v4, %v822_v10  ;;  %831 = vst.msk [vmem:[#allocation4 + $0x58] sm:$0xf] %vm707_vm10, %v822_v10  ;;  %v723_v13 = vsel %vm721_vm11, %v718_v52, %v720_v11  ;;  %v880_v38 = vld [vmem:[#allocation4 + $0x30] sm:$0xff] }
 0x147   : > { %730 = vst.msk [vmem:[#allocation4 + $0x10] sm:$0xf0] %vm729_vm1, %v720_v11  ;;  %830 = vst [vmem:[#allocation4 + $0x50] sm:$0xf] %v825_v12  ;;  %v1085_v11 = vshrl.u32 %v1084_v7, 7 }
 0x148   : > { %728 = vst [vmem:[#allocation4 + $0x8] sm:$0xf0] %v723_v13  ;;  %v699_v13 = vld [vmem:[%s3714_s7] sm:$0x7] }
 0x149   : > { %v802_v14 = vpop.permute.xlu1 %801  ;;  %v761_v15 = vpop.permute.xlu0 %760  ;;  %v1086_v12 = vsub.s32 0, %v1085_v11 }
 0x14a   : > { %v805_v16 = vsel %vm803_vm14, %v800_v55, %v802_v14  ;;  %811 = vst.msk [vmem:[#allocation4 + $0x40] sm:$0xf0] %vm729_vm1, %v802_v14  ;;  %v764_v17 = vsel %vm762_vm12, %v759_v54, %v761_v15  ;;  %770 = vst.msk [vmem:[#allocation4 + $0x28] sm:$0xf0] %vm729_vm1, %v761_v15 }
 0x14b   : > { %810 = vst [vmem:[#allocation4 + $0x38] sm:$0xf0] %v805_v16  ;;  %769 = vst [vmem:[#allocation4 + $0x20] sm:$0xf0] %v764_v17  ;;  %v3280_v16 = vrot.slane %v699_v13, %v1086_v12  ;;  %v1090_v17 = vsub.s32 1, %v1085_v11 }
 0x14d   : > { %v843_v18 = vpop.permute.xlu1 %842  ;;  %v818_v19 = vpop.permute.xlu0 %817  ;;  %v3286_v24 = vrot.slane %v699_v13, %v1090_v17 }
 0x14e   : > { %v846_v20 = vsel %vm844_vm2, %v841_v57, %v843_v18  ;;  %852 = vst.msk [vmem:[#allocation4 + $0x58] sm:$0xf0] %vm729_vm1, %v843_v18  ;;  %v824_v21 = vsel %vm823_vm0, %v818_v19, %v820_v4  ;;  %v876_v45 = vld [vmem:[#allocation4 + $0x10] sm:$0xff]  ;;  %vm1127_vm1 = vcmask 556032  }
 0x14f   : > { %851 = vst [vmem:[#allocation4 + $0x50] sm:$0xf0] %v846_v20  ;;  %829 = vst [vmem:[#allocation4 + $0x48] sm:$0xf] %v824_v21  ;;  %v875_v26 = vld [vmem:[#allocation4 + $0x8] sm:$0xff] }
 0x150   : > { %v3282_v21 = vld [vmem:[#allocation3] sm:$0xff] }
 0x151   : > { %v839_v22 = vpop.permute.xlu1 %838  ;;  %v861_v23 = vpop.permute.xlu0 %860  ;;  %v879_v42 = vld [vmem:[#allocation4 + $0x28] sm:$0xff]  ;;  %v882_v49 = vld [vmem:[#allocation4 + $0x40] sm:$0xff]  ;;  %337 = vst.msk [vmem:[#allocation3 + $0x10] sm:$0xff] %vm336_vm7, %v3282_v21 }
 0x152   : > { %v845_v25 = vsel %vm844_vm2, %v839_v22, %v841_v57  ;;  %v878_v27 = vld [vmem:[#allocation4 + $0x20] sm:$0xff]  ;;  %v881_v35 = vld [vmem:[#allocation4 + $0x38] sm:$0xff]  ;;  %v2614_v46 = vpack.c.bf16 %v879_v42, %v876_v45 }
 0x153   : > { %850 = vst [vmem:[#allocation4 + $0x48] sm:$0xf0] %v845_v25  ;;  %v2605_v28 = vpack.c.bf16 %v878_v27, %v875_v26  ;;  %v1094_v25 = vsub.s32 2, %v1085_v11 }
 0x155   : > { %v863_v31 = vpop.permute.xlu1 %862  ;;  %2606 = vmatprep.subr.bf16.mxu1 %v2605_v28  ;;  %v859_v32 = vpop.permute.xlu0 %858  ;;  %v885_v48 = vld [vmem:[#allocation4 + $0x58] sm:$0xff]  ;;  %v3291_v27 = vrot.slane %v699_v13, %v1094_v25 }
 0x156   : > { %v866_v33 = vsel %vm864_vm3, %v861_v23, %v863_v31  ;;  %872 = vst.msk [vmem:[#allocation4 + $0x70] sm:$0xf] %vm707_vm10, %v863_v31  ;;  %v865_v34 = vsel %vm864_vm3, %v859_v32, %v861_v23  ;;  %2608 = vmatpush1.bf16.msra.mxu1 %v2607_v30  ;;  %v884_v36 = vld [vmem:[#allocation4 + $0x50] sm:$0xff]  ;;  %v2617_v50 = vpack.c.bf16 %v885_v48, %v882_v49  ;;  %vm1111_vm10 = vcmask 154624  }
 0x157   : > { %871 = vst [vmem:[#allocation4 + $0x68] sm:$0xf] %v866_v33  ;;  %870 = vst [vmem:[#allocation4 + $0x60] sm:$0xf] %v865_v34  ;;  %v2609_v37 = vpack.c.bf16 %v884_v36, %v881_v35 }
 0x159   : > { %2610 = vmatprep.subr.bf16.mxu1 %v2609_v37 }
 0x15a   : > { %v883_v39 = vld [vmem:[#allocation4 + $0x48] sm:$0xff] }
 0x15b   : > { %v2611_v40 = vpack.c.bf16 %v883_v39, %v880_v38  ;;  %v2432_v38 = vld [vmem:[%s3713_s6 + $0x8] sm:$0xff] }
 0x15c   : > { %v2431_v39 = vld [vmem:[%s3712_s5 + $0x8] sm:$0xff] }
 0x15d   : > { %2612 = vmatpush1.bf16.msra.mxu1 %v2611_v40  ;;  %v888_v51 = vld [vmem:[#allocation4 + $0x70] sm:$0xf] }
 0x15e   : > { %v887_v41 = vld [vmem:[#allocation4 + $0x68] sm:$0xf]  ;;  %v886_v44 = vld [vmem:[#allocation4 + $0x60] sm:$0xf] }
 0x15f   : > { %2424 = vmatprep.subr.msk.mxu1 %vm893_vm4, %v887_v41 }
 0x161   : > { %2425 = vmatpush1.msk.msra.mxu1 %vm893_vm4, %v886_v44 }
 0x162   : > { %2426 = vmatmul.mubr.msk.f32.vlgmr.msra.gmra.mrb[0].mxu1 %vm889_vm5, %v873_v43  ;;  %2613 = vmatprep.subr.bf16.mxu1 %v2926_v47 }
 0x163   : > { %2615 = vmatpush3.bf16.msra.mxu1 %v2614_v46  ;;  %2534 = vmatprep.mubr.msk.f32.mxu1 %vm2927_vm6, %v2906_v0 }
 0x164   : > { %2616 = vmatprep.subr.bf16.mxu1 %v2926_v47 }
 0x166   : > { %v1048_v52 = vpop.permute.xlu1 %1047  ;;  %v1057_v54 = vpop.permute.xlu0 %1056 }
 0x167   : > { %2618 = vmatpush3.bf16.msra.mxu1 %v2617_v50 }
 0x168   : > { %2532 = vmatprep.subr.mxu1 %v2906_v0 }
 0x16b   : > { %2533 = vmatpush3.msk.msra.mxu1 %vm893_vm4, %v888_v51 }
 0x16c   : > { %2535 = vmatmul.mubr.msk.f32.vlgmr.msra.gmra.mrb[2].mxu1 %vm889_vm5, %v873_v43  ;;  %2635 = vmatprep.subr.bf16.mxu1 %v2926_v47  ;;  %vm1317_vm5 = vcmask 588800  }
 0x16d   : > { %2555 = vmatprep.mubr.msk.f32.mxu1 %vm2927_vm6, %v2906_v0 }
 0x235   : > { %v969_v53 = vpop.f32.mrb[0].mxu1 }
 0x236   : > { %v1050_v55 = vmul.f32 %v1048_v52, %v969_v53  ;;  %v971_v56 = vpop.f32.mrb[1].mxu1 }
 0x237   : > { %v1051_v57 = vmul.f32 %v1048_v52, %v971_v56 }
 0x238   : > { %v1059_v58 = vadd.f32 %v1057_v54, %v1050_v55 }
 0x239   : > { %v1060_v59 = vadd.f32 %v1057_v54, %v1051_v57 }
 0x23a   : > { %v1062_v60 = vsub.f32 0.0, %v1059_v58 }
 0x23b   : > { %v1063_v61 = vsub.f32 0.0, %v1060_v59 }
 0x23c   : > { %v1065_v62 = vmul.f32 1.442695, %v1062_v60 }
 0x23d   : > { %v1067_v63 = vmul.f32 1.442695, %v1063_v61 }
 0x23e   : > { %2805 = vpow2.f32 %v1065_v62 }
 0x23f   : > { %2807 = vpow2.f32 %v1067_v63  ;;  %v1040_v1 = vpop.f32.mrb[2].mxu1 }
 0x240   : > { %v1052_v2 = vmul.f32 %v1048_v52, %v1040_v1  ;;  %v2536_v3 = vpop.f32.mrb[3].mxu1 }
 0x242   : > { %v1061_v4 = vadd.f32 %v1057_v54, %v1052_v2 }
 0x244   : > { %v1064_v5 = vsub.f32 0.0, %v1061_v4 }
 0x246   : > { %v1069_v0 = vmul.f32 1.442695, %v1064_v5 }
 0x248   : > { %v2806_v6 = vpop.eup %2805  ;;  %2809 = vpow2.f32 %v1069_v0 }
 0x249   : > { %v2808_v8 = vpop.eup %2807  ;;  %v1071_v9 = vadd.f32 1.0, %v2806_v6 }
 0x24a   : > { %v1072_v10 = vadd.f32 1.0, %v2808_v8 }
 0x24b   : > { %2811 = vrcp.f32 %v1071_v9 }
 0x24c   : > { %2813 = vrcp.f32 %v1072_v10 }
 0x252   : > { %v2810_v14 = vpop.eup %2809 }
 0x253   : > { %v1073_v15 = vadd.f32 1.0, %v2810_v14 }
 0x255   : > { %v2812_v18 = vpop.eup %2811  ;;  %2815 = vrcp.f32 %v1073_v15 }
 0x256   : > { %v2814_v19 = vpop.eup %2813  ;;  %v1080_v20 = vmul.f32 %v2812_v18, %v1059_v58 }
 0x257   : > { %v1081_v22 = vmul.f32 %v2814_v19, %v1060_v59 }
 0x258   : > { %v1099_v23 = vmul.f32 %v3280_v16, %v1080_v20 }
 0x259   : > { %v1100_v26 = vmul.f32 %v3286_v24, %v1081_v22 }
 0x25a   : > { %1105 = vrot.lane.b32.xlu1 %v1099_v23, %s2928_s23 }
 0x25e   : > { %1107 = vrot.lane.b32.xlu1 %v1100_v26, %s2928_s23 }
 0x25f   : > { %v2816_v28 = vpop.eup %2815 }
 0x260   : > { %v1082_v29 = vmul.f32 %v2816_v28, %v1061_v4 }
 0x262   : > { %v1101_v30 = vmul.f32 %v3291_v27, %v1082_v29 }
 0x264   : > { %1109 = vrot.lane.b32.xlu0 %v1101_v30, %s2928_s23 }
 0x2cc   : > { %v1106_v31 = vpop.permute.xlu1 %1105 }
 0x2cd   : > { %1118 = vst.msk [vmem:[#allocation3] sm:$0xff] %vm1117_vm8, %v1106_v31 }
 0x2d0   : > { %v1108_v33 = vpop.permute.xlu1 %1107 }
 0x2d1   : > { %v1112_v36 = vsel %vm1111_vm10, %v1106_v31, %v1108_v33 }
 0x2d4   : > { %v3296_v32 = vld [vmem:[#allocation3] sm:$0xff] }
 0x2d5   : > { %1155 = vrot.lane.b32.xlu0 %v3296_v32, %s2912_s16  ;;  %1135 = vrot.lane.b32.xlu1 %v3296_v32, %s2922_s29 }
 0x2d6   : > { %v1110_v34 = vpop.permute.xlu0 %1109 }
 0x2d7   : > { %v1113_v35 = vsel %vm1111_vm10, %v1108_v33, %v1110_v34 }
 0x2d8   : > { %1121 = vst.msk [vmem:[#allocation3 + $0x10] sm:$0xff] %vm1120_vm9, %v1113_v35 }
 0x2d9   : > { %1195 = vrot.lane.b32.xlu0 %v3296_v32, %s2924_s22  ;;  %1175 = vrot.lane.b32.xlu1 %v3296_v32, %s2918_s26 }
 0x2dd   : > { %1215 = vrot.lane.b32.xlu1 %v3296_v32, %s3717_s17  ;;  %1157 = vrot.lane.b32.xlu0 %v1112_v36, %s2912_s16 }
 0x2df   : > { %v1124_v37 = vld [vmem:[#allocation3 + $0x10] sm:$0xff] }
 0x2e0   : > { %1128 = vst.msk [vmem:[#allocation4 + $0x10] sm:$0xff] %vm1127_vm1, %v1124_v37 }
 0x2e1   : > { %1177 = vrot.lane.b32.xlu0 %v1112_v36, %s2918_s26  ;;  %1137 = vrot.lane.b32.xlu1 %v1112_v36, %s2922_s29 }
 0x2e5   : > { %1197 = vrot.lane.b32.xlu0 %v1112_v36, %s2924_s22  ;;  %1159 = vrot.lane.b32.xlu1 %v1124_v37, %s2912_s16 }
 0x2e7   : > { %v1292_v8 = vld [vmem:[#allocation4 + $0x10] sm:$0xff] }
 0x2e9   : > { %1217 = vrot.lane.b32.xlu0 %v1112_v36, %s3717_s17  ;;  %1179 = vrot.lane.b32.xlu1 %v1124_v37, %s2918_s26 }
 0x2ed   : > { %1139 = vrot.lane.b32.xlu0 %v1124_v37, %s2922_s29  ;;  %1199 = vrot.lane.b32.xlu1 %v1124_v37, %s2924_s22 }
 0x2f1   : > { %1237 = vrot.lane.b32.xlu0 %v1112_v36, %s2917_s24  ;;  %1219 = vrot.lane.b32.xlu1 %v1124_v37, %s3717_s17 }
 0x2f5   : > { %1257 = vrot.lane.b32.xlu0 %v1112_v36, %s3721_s21  ;;  %1239 = vrot.lane.b32.xlu1 %v1124_v37, %s2917_s24 }
 0x2f9   : > { %1235 = vrot.lane.b32.xlu0 %v3296_v32, %s2917_s24  ;;  %1259 = vrot.lane.b32.xlu1 %v1124_v37, %s3721_s21 }
 0x2fd   : > { %1277 = vrot.lane.b32.xlu0 %v1112_v36, %s3719_s14  ;;  %1255 = vrot.lane.b32.xlu1 %v3296_v32, %s3721_s21 }
 0x301   : > { %1275 = vrot.lane.b32.xlu0 %v3296_v32, %s3719_s14  ;;  %1279 = vrot.lane.b32.xlu1 %v1124_v37, %s3719_s14 }
 0x305   : > { %1476 = vperm.xlu0 %2782, %v2432_v38   ;;  %1466 = vperm.xlu1 %2781, %v2431_v39  }
 0x347   : > { %v1156_v40 = vpop.permute.xlu0 %1155  ;;  %v1136_v41 = vpop.permute.xlu1 %1135 }
 0x34b   : > { %v1196_v42 = vpop.permute.xlu0 %1195  ;;  %v1176_v43 = vpop.permute.xlu1 %1175 }
 0x34f   : > { %v1158_v44 = vpop.permute.xlu0 %1157  ;;  %v1216_v45 = vpop.permute.xlu1 %1215 }
 0x350   : > { %v1161_v3 = vsel %vm626_vm15, %v1156_v40, %v1158_v44  ;;  %v1289_v40 = vld [vmem:[%s3709_s2] sm:$0xff] }
 0x353   : > { %v1178_v46 = vpop.permute.xlu0 %1177  ;;  %v1138_v48 = vpop.permute.xlu1 %1137 }
 0x354   : > { %v1141_v53 = vsel %vm721_vm11, %v1136_v41, %v1138_v48  ;;  %v1181_v61 = vsel %vm762_vm12, %v1176_v43, %v1178_v46 }
 0x355   : > { %v2621_v60 = vpack.c.bf16 %v1141_v53, %v3296_v32  ;;  %v2625_v5 = vpack.c.bf16 %v1181_v61, %v1161_v3 }
 0x357   : > { %v1198_v49 = vpop.permute.xlu0 %1197  ;;  %v1160_v50 = vpop.permute.xlu1 %1159 }
 0x358   : > { %1168 = vst.msk [vmem:[#allocation4 + $0x40] sm:$0xff] %vm1127_vm1, %v1160_v50  ;;  %v1162_v59 = vsel %vm626_vm15, %v1158_v44, %v1160_v50  ;;  %v1201_v12 = vsel %vm782_vm13, %v1196_v42, %v1198_v49 }
 0x35b   : > { %v1218_v51 = vpop.permute.xlu0 %1217  ;;  %v1180_v52 = vpop.permute.xlu1 %1179 }
 0x35c   : > { %1188 = vst.msk [vmem:[#allocation4 + $0x58] sm:$0xff] %vm1127_vm1, %v1180_v52  ;;  %v1182_v56 = vsel %vm762_vm12, %v1178_v46, %v1180_v52  ;;  %v1221_v0 = vsel %vm803_vm14, %v1216_v45, %v1218_v51 }
 0x35d   : > { %v2623_v1 = vpack.c.bf16 %v1182_v56, %v1162_v59  ;;  %v2629_v14 = vpack.c.bf16 %v1221_v0, %v1201_v12 }
 0x35f   : > { %v1140_v54 = vpop.permute.xlu0 %1139  ;;  %v1200_v55 = vpop.permute.xlu1 %1199  ;;  %v1298_v18 = vld [vmem:[#allocation4 + $0x40] sm:$0xff] }
 0x360   : > { %v1142_v57 = vsel %vm721_vm11, %v1138_v48, %v1140_v54  ;;  %1148 = vst.msk [vmem:[#allocation4 + $0x28] sm:$0xff] %vm1127_vm1, %v1140_v54  ;;  %1208 = vst.msk [vmem:[#allocation4 + $0x70] sm:$0xff] %vm1127_vm1, %v1200_v55  ;;  %v1202_v4 = vsel %vm782_vm13, %v1198_v49, %v1200_v55 }
 0x361   : > { %v2619_v58 = vpack.c.bf16 %v1142_v57, %v1112_v36 }
 0x363   : > { %v1238_v62 = vpop.permute.xlu0 %1237  ;;  %v1220_v63 = vpop.permute.xlu1 %1219  ;;  %2620 = vmatprep.subr.bf16.mxu0 %v2619_v58  ;;  %v1301_v13 = vld [vmem:[#allocation4 + $0x58] sm:$0xff] }
 0x364   : > { %v1222_v2 = vsel %vm803_vm14, %v1218_v51, %v1220_v63  ;;  %1228 = vst.msk [vmem:[#allocation4 + $0x88] sm:$0xff] %vm1127_vm1, %v1220_v63  ;;  %2622 = vmatpush1.bf16.msra.mxu0 %v2621_v60  ;;  %v2639_v22 = vpack.c.bf16 %v1301_v13, %v1298_v18  ;;  %v1882_v18 = vld [vmem:[#allocation2] sm:$0xff] }
 0x365   : > { %2624 = vmatprep.subr.bf16.mxu0 %v2623_v1  ;;  %v2627_v10 = vpack.c.bf16 %v1222_v2, %v1202_v4 }
 0x367   : > { %v1258_v6 = vpop.permute.xlu0 %1257  ;;  %v1240_v7 = vpop.permute.xlu1 %1239  ;;  %v1295_v9 = vld [vmem:[#allocation4 + $0x28] sm:$0xff]  ;;  %v1304_v29 = vld [vmem:[#allocation4 + $0x70] sm:$0xff] }
 0x368   : > { %1248 = vst.msk [vmem:[#allocation4 + $0xa0] sm:$0xff] %vm1127_vm1, %v1240_v7  ;;  %v2636_v11 = vpack.c.bf16 %v1295_v9, %v1292_v8  ;;  %2626 = vmatpush1.bf16.msra.mxu0 %v2625_v5  ;;  %v1242_v19 = vsel %vm823_vm0, %v1238_v62, %v1240_v7 }
 0x369   : > { %2628 = vmatprep.subr.bf16.mxu0 %v2627_v10 }
 0x36a   : > { %2637 = vmatpush3.bf16.msra.mxu1 %v2636_v11 }
 0x36b   : > { %v1236_v15 = vpop.permute.xlu0 %1235  ;;  %v1260_v17 = vpop.permute.xlu1 %1259  ;;  %2638 = vmatprep.subr.bf16.mxu1 %v2926_v47  ;;  %v1307_v23 = vld [vmem:[#allocation4 + $0x88] sm:$0xff] }
 0x36c   : > { %v1262_v20 = vsel %vm844_vm2, %v1258_v6, %v1260_v17  ;;  %1268 = vst.msk [vmem:[#allocation4 + $0xb8] sm:$0xff] %vm1127_vm1, %v1260_v17  ;;  %2630 = vmatpush1.bf16.msra.mxu0 %v2629_v14  ;;  %v1241_v30 = vsel %vm823_vm0, %v1236_v15, %v1238_v62  ;;  %v2642_v32 = vpack.c.bf16 %v1307_v23, %v1304_v29  ;;  %v2442_v23 = vld [vmem:[%s3712_s5 + $0x18] sm:$0xff] }
 0x36d   : > { %v2631_v25 = vpack.c.bf16 %v1262_v20, %v1242_v19  ;;  %v1886_v19 = vcombine.high %v1882_v18, %v1882_v18  ;;  %v1883_v20 = vld [vmem:[#allocation2 + $0x8] sm:$0xf] }
 0x36e   : > { %2640 = vmatpush3.bf16.msra.mxu1 %v2639_v22  ;;  %v2435_v22 = vld [vmem:[%s3712_s5 + $0x10] sm:$0xff] }
 0x36f   : > { %v1278_v26 = vpop.permute.xlu0 %1277  ;;  %v1256_v28 = vpop.permute.xlu1 %1255  ;;  %2641 = vmatprep.subr.bf16.mxu1 %v2926_v47  ;;  %2632 = vmatprep.subr.bf16.mxu0 %v2631_v25  ;;  %v1310_v36 = vld [vmem:[#allocation4 + $0xa0] sm:$0xff]  ;;  %v2436_v25 = vld [vmem:[%s3713_s6 + $0x10] sm:$0xff] }
 0x370   : > { %v1261_v31 = vsel %vm844_vm2, %v1256_v28, %v1258_v6 }
 0x371   : > { %v2633_v33 = vpack.c.bf16 %v1261_v31, %v1241_v30 }
 0x372   : > { %2643 = vmatpush3.bf16.msra.mxu1 %v2642_v32 }
 0x373   : > { %v1276_v34 = vpop.permute.xlu0 %1275  ;;  %v1280_v35 = vpop.permute.xlu1 %1279  ;;  %2644 = vmatprep.subr.bf16.mxu1 %v2926_v47  ;;  %v1313_v37 = vld [vmem:[#allocation4 + $0xb8] sm:$0xff]  ;;  %2634 = vmatpush1.bf16.msra.mxu0 %v2633_v33 }
 0x374   : > { %v1282_v38 = vsel %vm864_vm3, %v1278_v26, %v1280_v35  ;;  %1288 = vst.msk [vmem:[#allocation4 + $0xd0] sm:$0xff] %vm1127_vm1, %v1280_v35  ;;  %v2645_v39 = vpack.c.bf16 %v1313_v37, %v1310_v36  ;;  %v1281_v41 = vsel %vm864_vm3, %v1276_v34, %v1278_v26  ;;  %v2443_v26 = vld [vmem:[%s3713_s6 + $0x18] sm:$0xff] }
 0x375   : > { %1337 = vmatprep.subr.mxu0 %v1282_v38 }
 0x376   : > { %2646 = vmatpush3.bf16.msra.mxu1 %v2645_v39 }
 0x377   : > { %2553 = vmatprep.subr.mxu1 %v3282_v21  ;;  %1338 = vmatpush1.msra.mxu0 %v1281_v41 }
 0x378   : > { %2429 = vmatmul.mubr.msk.f32.vlgmr.msra.gmra.mrb[0].mxu0 %vm1317_vm5, %v1289_v40 }
 0x379   : > { %1784 = vmatprep.mubr.f32.mxu0 %v3282_v21 }
 0x37b   : > { %v1316_v42 = vld [vmem:[#allocation4 + $0xd0] sm:$0xff] }
 0x37c   : > { %2554 = vmatpush3.msra.mxu1 %v1316_v42 }
 0x37d   : > { %2556 = vmatmul.mubr.msk.f32.vlgmr.msra.gmra.mrb[4].mxu1 %vm1317_vm5, %v1289_v40  ;;  %2663 = vmatprep.subr.bf16.mxu1 %v2926_v47 }
 0x37e   : > { %2576 = vmatprep.mubr.msk.f32.mxu1 %vm2927_vm6, %v3282_v21 }
 0x384   : > { %v1467_v43 = vpop.permute.xlu1 %1466  ;;  %v1477_v48 = vpop.permute.xlu0 %1476 }
 0x44b   : > { %v1387_v44 = vpop.f32.mrb[0].mxu0 }
 0x44c   : > { %v1469_v45 = vmul.f32 %v1467_v43, %v1387_v44  ;;  %v1389_v46 = vpop.f32.mrb[1].mxu0 }
 0x44d   : > { %v1470_v49 = vmul.f32 %v1467_v43, %v1389_v46 }
 0x44e   : > { %v1479_v50 = vadd.f32 %v1477_v48, %v1469_v45 }
 0x44f   : > { %v1480_v51 = vadd.f32 %v1477_v48, %v1470_v49 }
 0x450   : > { %v1458_v52 = vpop.f32.mrb[4].mxu1  ;;  %v1482_v53 = vsub.f32 0.0, %v1479_v50 }
 0x451   : > { %v1471_v54 = vmul.f32 %v1467_v43, %v1458_v52  ;;  %v1483_v55 = vsub.f32 0.0, %v1480_v51  ;;  %v2557_v56 = vpop.f32.mrb[5].mxu1 }
 0x452   : > { %v1485_v57 = vmul.f32 1.442695, %v1482_v53 }
 0x453   : > { %v1481_v58 = vadd.f32 %v1477_v48, %v1471_v54  ;;  %v1487_v59 = vmul.f32 1.442695, %v1483_v55 }
 0x454   : > { %2817 = vpow2.f32 %v1485_v57 }
 0x455   : > { %v1484_v60 = vsub.f32 0.0, %v1481_v58  ;;  %2819 = vpow2.f32 %v1487_v59 }
 0x457   : > { %v1489_v61 = vmul.f32 1.442695, %v1484_v60 }
 0x459   : > { %2821 = vpow2.f32 %v1489_v61 }
 0x45e   : > { %v2818_v62 = vpop.eup %2817 }
 0x45f   : > { %v2820_v63 = vpop.eup %2819  ;;  %v1491_v1 = vadd.f32 1.0, %v2818_v62 }
 0x460   : > { %v1492_v2 = vadd.f32 1.0, %v2820_v63 }
 0x461   : > { %2823 = vrcp.f32 %v1491_v1 }
 0x462   : > { %2825 = vrcp.f32 %v1492_v2 }
 0x463   : > { %v2822_v3 = vpop.eup %2821 }
 0x464   : > { %v1493_v4 = vadd.f32 1.0, %v2822_v3 }
 0x466   : > { %2827 = vrcp.f32 %v1493_v4 }
 0x46b   : > { %v2824_v5 = vpop.eup %2823 }
 0x46c   : > { %v2826_v0 = vpop.eup %2825  ;;  %v1500_v6 = vmul.f32 %v2824_v5, %v1479_v50 }
 0x46d   : > { %v1501_v7 = vmul.f32 %v2826_v0, %v1480_v51 }
 0x46e   : > { %v1503_v8 = vmul.f32 %v1500_v6, %v3280_v16 }
 0x46f   : > { %v1504_v9 = vmul.f32 %v1501_v7, %v3286_v24 }
 0x470   : > { %v2828_v10 = vpop.eup %2827  ;;  %1509 = vrot.lane.b32.xlu1 %v1503_v8, %s2928_s23 }
 0x471   : > { %v1502_v11 = vmul.f32 %v2828_v10, %v1481_v58  ;;  %1511 = vrot.lane.b32.xlu0 %v1504_v9, %s2928_s23 }
 0x473   : > { %v1505_v12 = vmul.f32 %v1502_v11, %v3291_v27 }
 0x475   : > { %1513 = vrot.lane.b32.xlu1 %v1505_v12, %s2928_s23 }
 0x4e2   : > { %v1510_v13 = vpop.permute.xlu1 %1509 }
 0x4e3   : > { %1520 = vst.msk [vmem:[#allocation3] sm:$0xff] %vm1117_vm8, %v1510_v13  ;;  %v1512_v14 = vpop.permute.xlu0 %1511 }
 0x4e4   : > { %v3386_v15 = vsel %vm1111_vm10, %v1510_v13, %v1512_v14 }
 0x4e5   : > { %1527 = vst [vmem:[#allocation4 + $0x8] sm:$0xff] %v3386_v15 }
 0x4e7   : > { %v1514_v16 = vpop.permute.xlu1 %1513 }
 0x4e8   : > { %v1516_v24 = vsel %vm1111_vm10, %v1512_v14, %v1514_v16 }
 0x4e9   : > { %1522 = vst.msk [vmem:[#allocation3 + $0x10] sm:$0xff] %vm1120_vm9, %v1516_v24 }
 0x4ea   : > { %v3391_v17 = vld [vmem:[#allocation3] sm:$0xff] }
 0x4eb   : > { %1555 = vrot.lane.b32.xlu1 %v3391_v17, %s2912_s16  ;;  %1535 = vrot.lane.b32.xlu0 %v3391_v17, %s2922_s29  ;;  %1526 = vst [vmem:[#allocation4] sm:$0xff] %v3391_v17 }
 0x4ef   : > { %1595 = vrot.lane.b32.xlu1 %v3391_v17, %s2924_s22  ;;  %1575 = vrot.lane.b32.xlu0 %v3391_v17, %s2918_s26 }
 0x4f0   : > { %v1531_v27 = vld [vmem:[#allocation3 + $0x10] sm:$0xff] }
 0x4f1   : > { %1528 = vst.msk [vmem:[#allocation4 + $0x10] sm:$0xff] %vm1127_vm1, %v1531_v27 }
 0x4f3   : > { %1635 = vrot.lane.b32.xlu1 %v3391_v17, %s2917_s24  ;;  %1615 = vrot.lane.b32.xlu0 %v3391_v17, %s3725_s25 }
 0x4f7   : > { %1537 = vrot.lane.b32.xlu0 %v3386_v15, %s2922_s29  ;;  %1539 = vrot.lane.b32.xlu1 %v1531_v27, %s2922_s29 }
 0x4f8   : > { %v1692_v46 = vld [vmem:[#allocation4 + $0x10] sm:$0xff] }
 0x4fb   : > { %1559 = vrot.lane.b32.xlu0 %v1531_v27, %s2912_s16  ;;  %1557 = vrot.lane.b32.xlu1 %v3386_v15, %s2912_s16  ;;  %s2447_s16 = sshll.u32 %s3001_s13, 7  ;;  %s2929_s13 = smov [#allocation5]  }
 0x4fc   : > { %s3665_s28 = scalar_lea.hbm %s3716_s9, %s2447_s16 }
 0x4ff   : > { %1579 = vrot.lane.b32.xlu0 %v1531_v27, %s2918_s26  ;;  %1577 = vrot.lane.b32.xlu1 %v3386_v15, %s2918_s26 }
 0x503   : > { %1599 = vrot.lane.b32.xlu0 %v1531_v27, %s2924_s22  ;;  %1597 = vrot.lane.b32.xlu1 %v3386_v15, %s2924_s22 }
 0x507   : > { %1619 = vrot.lane.b32.xlu0 %v1531_v27, %s3725_s25  ;;  %1617 = vrot.lane.b32.xlu1 %v3386_v15, %s3725_s25 }
 0x50b   : > { %1639 = vrot.lane.b32.xlu0 %v1531_v27, %s2917_s24  ;;  %1637 = vrot.lane.b32.xlu1 %v3386_v15, %s2917_s24 }
 0x50f   : > { %1659 = vrot.lane.b32.xlu0 %v1531_v27, %s3721_s21  ;;  %1657 = vrot.lane.b32.xlu1 %v3386_v15, %s3721_s21 }
 0x513   : > { %1655 = vrot.lane.b32.xlu0 %v3391_v17, %s3721_s21  ;;  %1677 = vrot.lane.b32.xlu1 %v3386_v15, %s3719_s14 }
 0x517   : > { %1679 = vrot.lane.b32.xlu0 %v1531_v27, %s3719_s14  ;;  %1675 = vrot.lane.b32.xlu1 %v3391_v17, %s3719_s14  ;;  %s3726_s14 = smov 91  }
 0x51b   : > { %1889 = vrot.lane.b32.xlu0 %v1886_v19, %s2924_s22  ;;  %1891 = vrot.lane.b32.xlu1 %v1883_v20, %s2924_s22 }
 0x51f   : > { %1887 = vrot.lane.b32.xlu0 %v1882_v18, %s2924_s22  ;;  %1865 = vperm.xlu1 %2781, %v2435_v22   ;;  %s3727_s22 = smov 90  }
 0x523   : > { %2050 = vperm.xlu0 %2782, %v2442_v23   ;;  %1875 = vperm.xlu1 %2781, %v2436_v25   ;;  %v1689_v25 = vld [vmem:[%s3710_s3] sm:$0xff] }
 0x527   : > { %2060 = vperm.xlu0 %2782, %v2443_v26  }
 0x55d   : > { %v1536_v28 = vpop.permute.xlu0 %1535  ;;  %v1556_v29 = vpop.permute.xlu1 %1555 }
 0x561   : > { %v1576_v30 = vpop.permute.xlu0 %1575  ;;  %v1596_v31 = vpop.permute.xlu1 %1595 }
 0x565   : > { %v1616_v32 = vpop.permute.xlu0 %1615  ;;  %v1636_v33 = vpop.permute.xlu1 %1635 }
 0x569   : > { %v1538_v34 = vpop.permute.xlu0 %1537  ;;  %v1540_v35 = vpop.permute.xlu1 %1539 }
 0x56a   : > { %v1541_v36 = vsel %vm721_vm11, %v1536_v28, %v1538_v34  ;;  %v1542_v37 = vsel %vm721_vm11, %v1538_v34, %v1540_v35  ;;  %1548 = vst.msk [vmem:[#allocation4 + $0x28] sm:$0xff] %vm1127_vm1, %v1540_v35  ;;  %vm2342_vm11 = vcmask 523264  }
 0x56b   : > { %1546 = vst [vmem:[#allocation4 + $0x18] sm:$0xff] %v1541_v36  ;;  %1547 = vst [vmem:[#allocation4 + $0x20] sm:$0xff] %v1542_v37  ;;  %v2647_v38 = vpack.c.bf16 %v1542_v37, %v3386_v15  ;;  %v2649_v39 = vpack.c.bf16 %v1541_v36, %v3391_v17 }
 0x56d   : > { %v1560_v40 = vpop.permute.xlu0 %1559  ;;  %v1558_v41 = vpop.permute.xlu1 %1557  ;;  %2648 = vmatprep.subr.bf16.mxu0 %v2647_v38 }
 0x56e   : > { %1568 = vst.msk [vmem:[#allocation4 + $0x40] sm:$0xff] %vm1127_vm1, %v1560_v40  ;;  %v1561_v42 = vsel %vm626_vm15, %v1556_v29, %v1558_v41  ;;  %v1562_v43 = vsel %vm626_vm15, %v1558_v41, %v1560_v40  ;;  %2650 = vmatpush1.bf16.msra.mxu0 %v2649_v39  ;;  %vm1895_vm15 = vcmask 31744  }
 0x56f   : > { %1566 = vst [vmem:[#allocation4 + $0x30] sm:$0xff] %v1561_v42  ;;  %1567 = vst [vmem:[#allocation4 + $0x38] sm:$0xff] %v1562_v43 }
 0x571   : > { %v1580_v44 = vpop.permute.xlu0 %1579  ;;  %v1578_v45 = vpop.permute.xlu1 %1577  ;;  %v1695_v48 = vld [vmem:[#allocation4 + $0x28] sm:$0xff] }
 0x572   : > { %1588 = vst.msk [vmem:[#allocation4 + $0x58] sm:$0xff] %vm1127_vm1, %v1580_v44  ;;  %v1581_v49 = vsel %vm762_vm12, %v1576_v30, %v1578_v45  ;;  %v1582_v50 = vsel %vm762_vm12, %v1578_v45, %v1580_v44  ;;  %v2664_v51 = vpack.c.bf16 %v1695_v48, %v1692_v46 }
 0x573   : > { %1586 = vst [vmem:[#allocation4 + $0x48] sm:$0xff] %v1581_v49  ;;  %1587 = vst [vmem:[#allocation4 + $0x50] sm:$0xff] %v1582_v50  ;;  %v2651_v52 = vpack.c.bf16 %v1582_v50, %v1562_v43  ;;  %v2653_v53 = vpack.c.bf16 %v1581_v49, %v1561_v42 }
 0x574   : > { %2665 = vmatpush3.bf16.msra.mxu1 %v2664_v51 }
 0x575   : > { %v1600_v54 = vpop.permute.xlu0 %1599  ;;  %v1598_v55 = vpop.permute.xlu1 %1597  ;;  %2666 = vmatprep.subr.bf16.mxu1 %v2926_v47  ;;  %2652 = vmatprep.subr.bf16.mxu0 %v2651_v52  ;;  %v1698_v60 = vld [vmem:[#allocation4 + $0x40] sm:$0xff] }
 0x576   : > { %1608 = vst.msk [vmem:[#allocation4 + $0x70] sm:$0xff] %vm1127_vm1, %v1600_v54  ;;  %v1601_v56 = vsel %vm782_vm13, %v1596_v31, %v1598_v55  ;;  %v1602_v57 = vsel %vm782_vm13, %v1598_v55, %v1600_v54  ;;  %2654 = vmatpush1.bf16.msra.mxu0 %v2653_v53 }
 0x577   : > { %1606 = vst [vmem:[#allocation4 + $0x60] sm:$0xff] %v1601_v56  ;;  %1607 = vst [vmem:[#allocation4 + $0x68] sm:$0xff] %v1602_v57 }
 0x579   : > { %v1620_v58 = vpop.permute.xlu0 %1619  ;;  %v1618_v59 = vpop.permute.xlu1 %1617  ;;  %v1701_v61 = vld [vmem:[#allocation4 + $0x58] sm:$0xff] }
 0x57a   : > { %1628 = vst.msk [vmem:[#allocation4 + $0x88] sm:$0xff] %vm1127_vm1, %v1620_v58  ;;  %v1621_v62 = vsel %vm803_vm14, %v1616_v32, %v1618_v59  ;;  %v1622_v63 = vsel %vm803_vm14, %v1618_v59, %v1620_v58  ;;  %v2667_v1 = vpack.c.bf16 %v1701_v61, %v1698_v60  ;;  %v1881_v32 = vld [vmem:[%s3711_s4] sm:$0xff] }
 0x57b   : > { %v2655_v2 = vpack.c.bf16 %v1622_v63, %v1602_v57  ;;  %v2657_v3 = vpack.c.bf16 %v1621_v62, %v1601_v56 }
 0x57c   : > { %2668 = vmatpush3.bf16.msra.mxu1 %v2667_v1 }
 0x57d   : > { %v1640_v4 = vpop.permute.xlu0 %1639  ;;  %v1638_v5 = vpop.permute.xlu1 %1637  ;;  %2669 = vmatprep.subr.bf16.mxu1 %v2926_v47  ;;  %2656 = vmatprep.subr.bf16.mxu0 %v2655_v2  ;;  %v1704_v9 = vld [vmem:[#allocation4 + $0x70] sm:$0xff] }
 0x57e   : > { %1648 = vst.msk [vmem:[#allocation4 + $0xa0] sm:$0xff] %vm1127_vm1, %v1640_v4  ;;  %v1641_v0 = vsel %vm823_vm0, %v1636_v33, %v1638_v5  ;;  %v1642_v6 = vsel %vm823_vm0, %v1638_v5, %v1640_v4  ;;  %2658 = vmatpush1.bf16.msra.mxu0 %v2657_v3 }
 0x581   : > { %v1660_v7 = vpop.permute.xlu0 %1659  ;;  %v1658_v8 = vpop.permute.xlu1 %1657  ;;  %v1707_v10 = vld [vmem:[#allocation4 + $0x88] sm:$0xff] }
 0x582   : > { %1668 = vst.msk [vmem:[#allocation4 + $0xb8] sm:$0xff] %vm1127_vm1, %v1660_v7  ;;  %v1662_v11 = vsel %vm844_vm2, %v1658_v8, %v1660_v7  ;;  %v2670_v12 = vpack.c.bf16 %v1707_v10, %v1704_v9 }
 0x583   : > { %v2659_v13 = vpack.c.bf16 %v1662_v11, %v1642_v6 }
 0x584   : > { %2671 = vmatpush3.bf16.msra.mxu1 %v2670_v12 }
 0x585   : > { %v1656_v14 = vpop.permute.xlu0 %1655  ;;  %v1678_v15 = vpop.permute.xlu1 %1677  ;;  %2672 = vmatprep.subr.bf16.mxu1 %v2926_v47  ;;  %2660 = vmatprep.subr.bf16.mxu0 %v2659_v13  ;;  %v1710_v18 = vld [vmem:[#allocation4 + $0xa0] sm:$0xff] }
 0x586   : > { %v1661_v16 = vsel %vm844_vm2, %v1656_v14, %v1658_v8 }
 0x587   : > { %v2661_v24 = vpack.c.bf16 %v1661_v16, %v1641_v0  ;;  %v2171_v16 = vld [vmem:[%s3715_s8 + $0x80] sm:$0xff] }
 0x589   : > { %v1680_v17 = vpop.permute.xlu0 %1679  ;;  %v1676_v27 = vpop.permute.xlu1 %1675  ;;  %v1713_v19 = vld [vmem:[#allocation4 + $0xb8] sm:$0xff]  ;;  %2662 = vmatpush1.bf16.msra.mxu0 %v2661_v24  ;;  %v2172_v24 = vld [vmem:[%s3715_s8 + $0x88] sm:$0xff] }
 0x58a   : > { %v1682_v20 = vsel %vm864_vm3, %v1678_v15, %v1680_v17  ;;  %1688 = vst.msk [vmem:[#allocation4 + $0xd0] sm:$0xff] %vm1127_vm1, %v1680_v17  ;;  %v1681_v22 = vsel %vm864_vm3, %v1676_v27, %v1678_v15  ;;  %v2673_v23 = vpack.c.bf16 %v1713_v19, %v1710_v18  ;;  %v2155_v17 = vld [vmem:[%s3715_s8] sm:$0xff]  ;;  %v2675_v27 = vpack.c.bf16 %v2172_v24, %v2171_v16  ;;  %v2156_v18 = vld [vmem:[%s3715_s8 + $0x8] sm:$0xff]  ;;  %v2173_v19 = vld [vmem:[%s3715_s8 + $0x90] sm:$0xff] }
 0x58b   : > { %1736 = vmatprep.subr.mxu0 %v1682_v20  ;;  %v2174_v20 = vld [vmem:[%s3715_s8 + $0x98] sm:$0xff]  ;;  %v2185_v16 = vld [vmem:[%s3715_s8 + $0xf0] sm:$0xff] }
 0x58c   : > { %2674 = vmatpush3.bf16.msra.mxu1 %v2673_v23  ;;  %v2679_v23 = vpack.c.bf16 %v2174_v20, %v2173_v19  ;;  %v2186_v24 = vld [vmem:[%s3715_s8 + $0xf8] sm:$0xff]  ;;  %v2195_v20 = vld [vmem:[%s3715_s8 + $0x140] sm:$0xf] }
 0x58d   : > { %v1890_v26 = vpop.permute.xlu0 %1889  ;;  %v1892_v28 = vpop.permute.xlu1 %1891  ;;  %2574 = vmatprep.subr.mxu1 %v3282_v21  ;;  %1737 = vmatpush1.msra.mxu0 %v1681_v22  ;;  %v2677_v22 = vpack.c.bf16 %v2156_v18, %v2155_v17  ;;  %v2169_v18 = vld [vmem:[%s3715_s8 + $0x70] sm:$0xff]  ;;  %v2170_v19 = vld [vmem:[%s3715_s8 + $0x78] sm:$0xff] }
 0x58e   : > { %v1894_v29 = vsel %vm782_vm13, %v1890_v26, %v1892_v28  ;;  %2433 = vmatmul.mubr.msk.f32.vlgmr.msra.gmra.mrb[2].mxu0 %vm1317_vm5, %v1689_v25 }
 0x58f   : > { %2437 = vmatprep.subr.msk.mxu0 %vm893_vm4, %v1894_v29  ;;  %1969 = vmatprep.mubr.f32.mxu0 %v3282_v21  ;;  %v2176_v29 = vld [vmem:[%s3715_s8 + $0xa8] sm:$0xff] }
 0x591   : > { %v1888_v30 = vpop.permute.xlu0 %1887  ;;  %v1716_v31 = vld [vmem:[#allocation4 + $0xd0] sm:$0xff] }
 0x592   : > { %v1893_v33 = vsel %vm782_vm13, %v1888_v30, %v1890_v26  ;;  %2575 = vmatpush3.msra.mxu1 %v1716_v31  ;;  %v2158_v26 = vld [vmem:[%s3715_s8 + $0x18] sm:$0xff]  ;;  %v2187_v31 = vld [vmem:[%s3715_s8 + $0x100] sm:$0xff] }
 0x593   : > { %2577 = vmatmul.mubr.msk.f32.vlgmr.msra.gmra.mrb[6].mxu1 %vm1317_vm5, %v1689_v25  ;;  %2438 = vmatpush1.msk.msra.mxu0 %vm893_vm4, %v1893_v33  ;;  %v2157_v25 = vld [vmem:[%s3715_s8 + $0x10] sm:$0xff]  ;;  %v2159_v33 = vld [vmem:[%s3715_s8 + $0x20] sm:$0xff] }
 0x594   : > { %2579 = vmatprep.subr.mxu0 %v3282_v21  ;;  %2439 = vmatmul.mubr.msk.f32.vlgmr.msra.gmra.mrb[4].mxu0 %vm1895_vm15, %v1881_v32  ;;  %v2681_v30 = vpack.c.bf16 %v2158_v26, %v2157_v25 }
 0x595   : > { %2580 = vmatpush3.msk.msra.mxu0 %vm893_vm4, %v1892_v28  ;;  %2581 = vmatprep.mubr.msk.f32.mxu0 %vm2927_vm6, %v3282_v21  ;;  %v2175_v28 = vld [vmem:[%s3715_s8 + $0xa0] sm:$0xff] }
 0x596   : > { %2707 = vmatprep.subr.bf16.mxu1 %v2926_v47  ;;  %2602 = vmatprep.mubr.msk.f32.mxu1 %vm2927_vm6, %v3282_v21 }
 0x597   : > { %2676 = vmatprep.subr.bf16.mxu0 %v2675_v27  ;;  %v2703_v27 = vpack.c.bf16 %v2186_v24, %v2185_v16 }
 0x598   : > { %2582 = vmatmul.mubr.msk.f32.vlgmr.msra.gmra.mrb[6].mxu0 %vm1895_vm15, %v1881_v32  ;;  %v2683_v32 = vpack.c.bf16 %v2176_v29, %v2175_v28 }
 0x599   : > { %2678 = vmatpush3.bf16.msra.mxu0 %v2677_v22  ;;  %v2705_v22 = vpack.c.bf16 %v2170_v19, %v2169_v18 }
 0x59a   : > { %2680 = vmatprep.subr.bf16.mxu0 %v2679_v23 }
 0x59d   : > { %2682 = vmatpush3.bf16.msra.mxu0 %v2681_v30 }
 0x59e   : > { %v1866_v36 = vpop.permute.xlu1 %1865  ;;  %2684 = vmatprep.subr.bf16.mxu0 %v2683_v32 }
 0x5a2   : > { %v2051_v37 = vpop.permute.xlu0 %2050  ;;  %v1876_v45 = vpop.permute.xlu1 %1875 }
 0x5a6   : > { %v2061_v46 = vpop.permute.xlu0 %2060 }
 0x661   : > { %v1786_v34 = vpop.f32.mrb[2].mxu0 }
 0x662   : > { %v1788_v35 = vpop.f32.mrb[3].mxu0  ;;  %v1868_v39 = vmul.f32 %v1866_v36, %v1786_v34  ;;  %v2160_v34 = vld [vmem:[%s3715_s8 + $0x28] sm:$0xff] }
 0x663   : > { %v1869_v40 = vmul.f32 %v1866_v36, %v1788_v35  ;;  %v2188_v35 = vld [vmem:[%s3715_s8 + $0x108] sm:$0xff] }
 0x664   : > { %v1878_v50 = vadd.f32 %v1876_v45, %v1868_v39  ;;  %v2189_v39 = vld [vmem:[%s3715_s8 + $0x110] sm:$0xff] }
 0x665   : > { %v1879_v52 = vadd.f32 %v1876_v45, %v1869_v40  ;;  %v2190_v40 = vld [vmem:[%s3715_s8 + $0x118] sm:$0xff] }
 0x666   : > { %v1857_v38 = vpop.f32.mrb[6].mxu1 }
 0x667   : > { %v1971_v41 = vpop.f32.mrb[4].mxu0  ;;  %v2578_v42 = vpop.f32.mrb[7].mxu1  ;;  %v1870_v49 = vmul.f32 %v1866_v36, %v1857_v38  ;;  %v2177_v36 = vld [vmem:[%s3715_s8 + $0xb0] sm:$0xff]  ;;  %v2708_v38 = vpack.c.bf16 %v2188_v35, %v2187_v31 }
 0x668   : > { %v2053_v43 = vmul.f32 %v2051_v37, %v1971_v41  ;;  %v1973_v44 = vpop.f32.mrb[5].mxu0  ;;  %v2685_v41 = vpack.c.bf16 %v2160_v34, %v2159_v33  ;;  %v2711_v42 = vpack.c.bf16 %v2190_v40, %v2189_v39 }
 0x669   : > { %v2054_v48 = vmul.f32 %v2051_v37, %v1973_v44  ;;  %v1880_v59 = vadd.f32 %v1876_v45, %v1870_v49  ;;  %2709 = vmatpush3.bf16.msra.mxu1 %v2708_v38  ;;  %v2161_v44 = vld [vmem:[%s3715_s8 + $0x30] sm:$0xff]  ;;  %v2162_v45 = vld [vmem:[%s3715_s8 + $0x38] sm:$0xff] }
 0x66a   : > { %v2063_v51 = vadd.f32 %v2061_v46, %v2053_v43  ;;  %2710 = vmatprep.subr.bf16.mxu1 %v2926_v47  ;;  %2686 = vmatpush3.bf16.msra.mxu0 %v2685_v41  ;;  %v2689_v49 = vpack.c.bf16 %v2162_v45, %v2161_v44 }
 0x66b   : > { %v2064_v53 = vadd.f32 %v2061_v46, %v2054_v48  ;;  %v2042_v54 = vpop.f32.mrb[6].mxu0  ;;  %v2180_v48 = vld [vmem:[%s3715_s8 + $0xc8] sm:$0xff] }
 0x66c   : > { %v2066_v55 = vadd.f32 %v2063_v51, %v1878_v50  ;;  %v2055_v56 = vmul.f32 %v2051_v37, %v2042_v54  ;;  %v2583_v57 = vpop.f32.mrb[7].mxu0  ;;  %v2178_v37 = vld [vmem:[%s3715_s8 + $0xb8] sm:$0xff]  ;;  %v2163_v51 = vld [vmem:[%s3715_s8 + $0x40] sm:$0xff] }
 0x66d   : > { %v2067_v58 = vadd.f32 %v2064_v53, %v1879_v52  ;;  %v2687_v43 = vpack.c.bf16 %v2178_v37, %v2177_v36  ;;  %2712 = vmatpush3.bf16.msra.mxu1 %v2711_v42  ;;  %v2164_v52 = vld [vmem:[%s3715_s8 + $0x48] sm:$0xff] }
 0x66e   : > { %v2069_v60 = vsub.f32 0.0, %v2066_v55  ;;  %v2065_v61 = vadd.f32 %v2061_v46, %v2055_v56  ;;  %v2179_v46 = vld [vmem:[%s3715_s8 + $0xc0] sm:$0xff]  ;;  %2713 = vmatprep.subr.bf16.mxu1 %v2926_v47  ;;  %v2693_v53 = vpack.c.bf16 %v2164_v52, %v2163_v51  ;;  %v2182_v56 = vld [vmem:[%s3715_s8 + $0xd8] sm:$0xff] }
 0x66f   : > { %v2070_v62 = vsub.f32 0.0, %v2067_v58  ;;  %2688 = vmatprep.subr.bf16.mxu0 %v2687_v43  ;;  %v2691_v50 = vpack.c.bf16 %v2180_v48, %v2179_v46 }
 0x670   : > { %v2072_v63 = vmul.f32 1.442695, %v2069_v60  ;;  %v2068_v1 = vadd.f32 %v2065_v61, %v1880_v59  ;;  %2690 = vmatpush3.bf16.msra.mxu0 %v2689_v49  ;;  %v2191_v59 = vld [vmem:[%s3715_s8 + $0x120] sm:$0xff]  ;;  %v2192_v60 = vld [vmem:[%s3715_s8 + $0x128] sm:$0xff]  ;;  %v2165_v61 = vld [vmem:[%s3715_s8 + $0x50] sm:$0xff] }
 0x671   : > { %v2074_v2 = vmul.f32 1.442695, %v2070_v62  ;;  %2692 = vmatprep.subr.bf16.mxu0 %v2691_v50 }
 0x672   : > { %2829 = vpow2.f32 %v2072_v63  ;;  %v2071_v3 = vsub.f32 0.0, %v2068_v1  ;;  %v2714_v63 = vpack.c.bf16 %v2192_v60, %v2191_v59 }
 0x673   : > { %2831 = vpow2.f32 %v2074_v2 }
 0x674   : > { %v2076_v4 = vmul.f32 1.442695, %v2071_v3  ;;  %2694 = vmatpush3.bf16.msra.mxu0 %v2693_v53  ;;  %2715 = vmatpush3.bf16.msra.mxu1 %v2714_v63 }
 0x675   : > { %2716 = vmatprep.subr.bf16.mxu1 %v2926_v47  ;;  %v2168_v47 = vld [vmem:[%s3715_s8 + $0x68] sm:$0xff] }
 0x676   : > { %2833 = vpow2.f32 %v2076_v4  ;;  %v2183_v4 = vld [vmem:[%s3715_s8 + $0xe0] sm:$0xff] }
 0x67c   : > { %v2830_v5 = vpop.eup %2829 }
 0x67d   : > { %v2832_v0 = vpop.eup %2831  ;;  %v2078_v6 = vadd.f32 1.0, %v2830_v5  ;;  %v2184_v5 = vld [vmem:[%s3715_s8 + $0xe8] sm:$0xff] }
 0x67e   : > { %v2079_v7 = vadd.f32 1.0, %v2832_v0 }
 0x67f   : > { %2835 = vrcp.f32 %v2078_v6  ;;  %v2699_v6 = vpack.c.bf16 %v2184_v5, %v2183_v4 }
 0x680   : > { %v2834_v8 = vpop.eup %2833  ;;  %2837 = vrcp.f32 %v2079_v7  ;;  %v2193_v7 = vld [vmem:[%s3715_s8 + $0x130] sm:$0xff] }
 0x681   : > { %v2080_v9 = vadd.f32 1.0, %v2834_v8  ;;  %v2194_v8 = vld [vmem:[%s3715_s8 + $0x138] sm:$0xff] }
 0x683   : > { %2839 = vrcp.f32 %v2080_v9  ;;  %v2167_v9 = vld [vmem:[%s3715_s8 + $0x60] sm:$0xff] }
 0x689   : > { %v2836_v10 = vpop.eup %2835 }
 0x68a   : > { %v2838_v11 = vpop.eup %2837  ;;  %v3500_v12 = vmul.f32 %v2836_v10, %v2066_v55  ;;  %v2181_v55 = vld [vmem:[%s3715_s8 + $0xd0] sm:$0xff]  ;;  %v2717_v10 = vpack.c.bf16 %v2194_v8, %v2193_v7 }
 0x68b   : > { %v3502_v13 = vmul.f32 %v2838_v11, %v2067_v58  ;;  %v2695_v58 = vpack.c.bf16 %v2182_v56, %v2181_v55  ;;  %v2701_v11 = vpack.c.bf16 %v2168_v47, %v2167_v9 }
 0x68c   : > { %2093 = vrot.lane.b32.xlu1 %v3500_v12, %s2928_s23  ;;  %2718 = vmatpush3.bf16.msra.mxu1 %v2717_v10 }
 0x68d   : > { %v2840_v14 = vpop.eup %2839  ;;  %2095 = vrot.lane.b32.xlu0 %v3502_v13, %s2928_s23  ;;  %2696 = vmatprep.subr.bf16.mxu0 %v2695_v58 }
 0x68e   : > { %v3508_v15 = vmul.f32 %v2840_v14, %v2068_v1  ;;  %v2166_v1 = vld [vmem:[%s3715_s8 + $0x58] sm:$0xff]  ;;  %2600 = vmatprep.subr.mxu1 %v3282_v21 }
 0x68f   : > { %v2697_v2 = vpack.c.bf16 %v2166_v1, %v2165_v61 }
 0x690   : > { %2097 = vrot.lane.b32.xlu1 %v3508_v15, %s2928_s23  ;;  %2601 = vmatpush3.msk.msra.mxu1 %vm893_vm4, %v2195_v20 }
 0x691   : > { %2698 = vmatpush3.bf16.msra.mxu0 %v2697_v2 }
 0x692   : > { %2700 = vmatprep.subr.bf16.mxu0 %v2699_v6 }
 0x695   : > { %2702 = vmatpush3.bf16.msra.mxu0 %v2701_v11 }
 0x696   : > { %2704 = vmatprep.subr.bf16.mxu0 %v2703_v27 }
 0x699   : > { %2706 = vmatpush3.bf16.msra.mxu0 %v2705_v22 }
 0x6fe   : > { %v2094_v54 = vpop.permute.xlu1 %2093 }
 0x6ff   : > { %2104 = vst.msk [vmem:[#allocation3] sm:$0xff] %vm1117_vm8, %v2094_v54  ;;  %v2096_v57 = vpop.permute.xlu0 %2095 }
 0x700   : > { %v2099_v62 = vsel %vm1111_vm10, %v2094_v54, %v2096_v57 }
 0x702   : > { %v2098_v3 = vpop.permute.xlu1 %2097 }
 0x703   : > { %v2100_v0 = vsel %vm1111_vm10, %v2096_v57, %v2098_v3 }
 0x704   : > { %2106 = vst.msk [vmem:[#allocation3 + $0x10] sm:$0xff] %vm1120_vm9, %v2100_v0 }
 0x706   : > { %v2107_v14 = vld [vmem:[#allocation3] sm:$0xff] }
 0x707   : > { %v2783_v17 = vpack.i.bf16 %v2107_v14, %v2099_v62 }
 0x709   : > { %2784 = vrot.lane.b32.xlu0 %v2783_v17, %s3725_s25 }
 0x70b   : > { %v2109_v21 = vld [vmem:[#allocation3 + $0x10] sm:$0xff] }
 0x70c   : > { %2117 = vrot.lane.b32.xlu1 %v2109_v21, %s3725_s25  ;;  %s323_s25 = sand.u32 1, %s2896_s10  }
 0x70d   : > { %2789 = vrot.lane.b32.xlu0 %v2783_v17, %s3726_s14  ;;  %s2421_s21 = sshll.u32 %s323_s25, 3  ;;  %s2345_s17 = scalar_lea.sflag [#allocation6], %s323_s25 }
 0x70e   : > { %s325_s24 = scalar_lea.vmem [#allocation5], %s2421_s21 }
 0x70f   : > { %s2358_s23 = sshll.u32 %s325_s24, 4  ;;  %s3667_s23 = int_to_ptr.vmem [resolvable:$true] %s2358_s23 }
 0x710   : > { %2131 = vrot.lane.b32.xlu1 %v2109_v21, %s3726_s14  ;;  %s2842_s27 = scalar_lea.vmem %s3667_s23, 128  ;;  %s2846_s14 = sshll.u32 %s2929_s13, 4  ;;  %s2847_s14 = int_to_ptr.vmem [resolvable:$false] %s2846_s14 }
 0x711   : > { %2794 = vrot.lane.b32.xlu0 %v2783_v17, %s3727_s22  ;;  %p2843_p11 = scmp.ne.s32.totalorder %s3667_s23, %s2842_s27  ;;  %p2849_p0 = scmp.lt.s32.totalorder %s3667_s23, %s2847_s14 }
 0x713   : > { %p2844_p12 = pnand %p2843_p11, %p3018_p5 }
 0x714   : > { %2145 = vrot.lane.b32.xlu1 %v2109_v21, %s3727_s22  ;;  %s2848_s22 = scalar_lea.vmem %s2847_s14, 256 }
 0x715   : > { %p2845_p13 = pneg %p2844_p12  ;;  %p2850_p1 = scmp.lt.s32.totalorder %s2848_s22, %s2842_s27 }
 0x717   : > { %p2851_p2 = por %p2850_p1, %p2849_p0 }
 0x719   : > { %p2852_p3 = pnand %p2851_p2, %p2845_p13 }
 0x77b   : > { %v2785_v23 = vpop.permute.xlu0 %2784 }
 0x77c   : > { %v2786_v25 = vunpack.i.l.bf16 %v2785_v23  ;;  %v2787_v26 = vunpack.i.h.bf16 %v2785_v23 }
 0x77e   : > { %v2118_v28 = vpop.permute.xlu1 %2117  ;;  %v2119_v33 = vsel %vm803_vm14, %v2787_v26, %v2786_v25 }
 0x77f   : > { %v2790_v29 = vpop.permute.xlu0 %2789  ;;  %v2120_v32 = vsel %vm803_vm14, %v2786_v25, %v2118_v28  ;;  %v2126_v35 = vmax.f32 %v3508_v15, %v2118_v28  ;;  %v2124_v42 = vmax.f32 %v3500_v12, %v2119_v33 }
 0x780   : > { %v2792_v30 = vunpack.i.h.bf16 %v2790_v29  ;;  %v2791_v31 = vunpack.i.l.bf16 %v2790_v29  ;;  %v2125_v38 = vmax.f32 %v3502_v13, %v2120_v32 }
 0x782   : > { %v2132_v34 = vpop.permute.xlu1 %2131  ;;  %v2133_v39 = vsel %vm844_vm2, %v2792_v30, %v2791_v31 }
 0x783   : > { %v2134_v36 = vsel %vm844_vm2, %v2791_v31, %v2132_v34  ;;  %v2795_v37 = vpop.permute.xlu0 %2794  ;;  %v2140_v43 = vmax.f32 %v2126_v35, %v2132_v34  ;;  %v2138_v48 = vmax.f32 %v2124_v42, %v2133_v39 }
 0x784   : > { %v2797_v40 = vunpack.i.h.bf16 %v2795_v37  ;;  %v2796_v41 = vunpack.i.l.bf16 %v2795_v37  ;;  %v2139_v44 = vmax.f32 %v2125_v38, %v2134_v36 }
 0x786   : > { %v2147_v45 = vsel %vm864_vm3, %v2797_v40, %v2796_v41  ;;  %v2146_v46 = vpop.permute.xlu1 %2145 }
 0x787   : > { %v2148_v15 = vsel %vm864_vm3, %v2796_v41, %v2146_v46  ;;  %v2154_v49 = vmax.f32 %v2140_v43, %v2146_v46  ;;  %v2152_v51 = vmax.f32 %v2138_v48, %v2147_v45 }
 0x788   : > { %v2153_v50 = vmax.f32 %v2139_v44, %v2148_v15 }
 0x789   : > { %2603 = vmatmul.mubr.msk.f32.vlgmr.msra.gmra.mrb[8].mxu1 %vm1127_vm1, %v2154_v49 }
 0x78a   : > { %2266 = vmatprep.mubr.f32.mxu0 %v2153_v50 }
 0x78b   : > { %2267 = vmatmul.mubr.f32.vlgmr.msra.gmra.mrb[8].mxu0 %v2152_v51 }
 0x85c   : > { %v2338_v13 = vpop.f32.mrb[8].mxu1 }
 0x85d   : > { %v2604_v12 = vpop.f32.mrb[9].mxu1 }
 0x85e   : > { %v2511_v52 = vpop.f32.mrb[8].mxu0 }
 0x85f   : > { %v2512_v53 = vpop.f32.mrb[9].mxu0 }
 0x860   : > { %v2513_v54 = vadd.f32 %v2512_v53, %v2511_v52 }
 0x862   : > { %v2339_v55 = vadd.f32 %v2513_v54, %v2338_v13 }
 0x864   : > { %2343 = vst.msk [vmem:[%s325_s24] sm:$0xff] %vm2342_vm11, %v2339_v55 }
 0x865   : > { %2855 = shalt.err (!%p2852_p3)
}
 0x866   : > { %s2856_s25 = scalar_lea.hbm %s3665_s28, 128  ;;  %s2860_s24 = scalar_lea.hbm %s3716_s9, 256 }
 0x867   : > { %p2857_p4 = scmp.ne.s32.totalorder %s3665_s28, %s2856_s25  ;;  %p2861_p9 = scmp.lt.u32.totalorder %s3665_s28, %s3716_s9 }
 0x868   : > { %p2862_p10 = scmp.lt.u32.totalorder %s2860_s24, %s2856_s25  ;;  %p2864_p12 = scmp.lt.u32.totalorder %s2856_s25, %s3665_s28 }
 0x869   : > { %p2858_p7 = pnand %p2857_p4, %p3018_p5 }
 0x86a   : > { %p2863_p11 = por %p2862_p10, %p2861_p9 }
 0x86b   : > { %p2859_p8 = pneg %p2858_p7 }
 0x86c   : > { %p2865_p13 = por %p2864_p12, %p2863_p11 }
 0x86e   : > { %p2866_p0 = pnand %p2865_p13, %p2859_p8 }
 0x870   : > { %2869 = shalt.err (!%p2866_p0)
}
 0x871   : > { %2719 = dma.vmem_to_hbm [thread:$0]  (%p3018_p5), %s3667_s23, 128, %s3665_s28, %s2345_s17  }
 0x872 PF: > { %p2725_p1 = scmp.ge.s32.totalorder %s2904_s12, 2  ;;  %s2370_s27 = sand.u32 1, %s2892_s30  }
 0x873   : > { %s2371_s13 = scalar_lea.sflag [#allocation6], %s2370_s27 }
 0x874   : > { %p2722_p2 = pnand %p2725_p1, %p3022_p6 }
 0x876   : > { %2887 = dma.done.wait (!%p2722_p2), %s2371_s13, 128  }
 0x877   : > { %2889 = vsyncadd (!%p2722_p2), %s2371_s13, 4294967168  ;;  %p19_p3 = scmp.ge.s32.totalorder %s3005_s15, 4   ;;  %s3728_s30 = smov %s2896_s10 }
 0x878   : > { %s3729_s10 = smov %s2900_s11  ;;  %s3730_s11 = smov %s3016_s18 }
 0x879   : > { %s3731_s12 = smov %s3005_s15  ;;  %21 = sbr.rel (!%p19_p3) target bundleno = 3 (0x3), region = 97 }
 0x880   :  { %2376 = vsyncpa [#allocation6], 1 }
 0x881   :  { %2378 = vsyncpa [#allocation6 + $0x1], 1 }

</bundles_post_ra>
